<compile_context>
chip_gen: v7x
topology: tpu7x:2x2x1
jax: 0.10.0
libtpu: 0.0.40
codegen_flags: <defaults>
</compile_context>

<pallas_src>
import jax
import jax.numpy as jnp
import numpy as np
from jax.experimental import pallas as pl
from jax.experimental.pallas import tpu as pltpu


def _round_up(x: int, m: int) -> int:
    return ((x + m - 1) // m) * m


def rnn_chunk_kernel(proj_ref, whh_ref, lens_ref, o_ref, h_ref):
    """One (batch_block, time_chunk) grid step of the recurrence.

    proj_ref: (B_BLK, T_CHUNK, HP) f32   precomputed x @ W_ih^T + bias
    whh_ref:  (HP, HP)             cd    W_hh^T (compute dtype, zero-padded)
    lens_ref: (B_BLK, 1)           i32   per-row valid lengths
    o_ref:    (B_BLK, T_CHUNK, HP) f32   output block (lane-dense, HP % 128 == 0)
    h_ref:    (B_BLK, HP)          f32   persistent hidden-state scratch
    """
    t_chunk = proj_ref.shape[1]
    c = pl.program_id(1)  # time-chunk axis (sequential / "arbitrary")

    @pl.when(c == 0)
    def _():
        h_ref[...] = jnp.zeros_like(h_ref)

    proj = proj_ref[...]          # (B_BLK, T_CHUNK, HP) f32
    whh = whh_ref[...]            # (HP, HP) compute dtype
    lens = lens_ref[...]          # (B_BLK, 1) int32
    h = h_ref[...]                # (B_BLK, HP) f32
    t0 = c * t_chunk

    # Statically unrolled inner time loop: only the sequential work lives here
    # (h @ W_hh^T on the MXU, tanh on the EUP, mask select on the VPU).
    # All elementwise math stays in f32; only the MXU operands are cast.
    for tt in range(t_chunk):
        pre = proj[:, tt, :] + jnp.dot(
            h.astype(whh.dtype), whh, preferred_element_type=jnp.float32)
        h_new = jnp.tanh(pre)                         # (B_BLK, HP) f32
        valid = lens > (t0 + tt)                      # (B_BLK, 1) bool
        h = jnp.where(valid, h_new, h)                # freeze state past length
        o_ref[:, tt, :] = jnp.where(valid, h_new, 0.0).astype(o_ref.dtype)

    h_ref[...] = h


def rnn_wrapper_forward(x, mask, w_ih, w_hh, b_ih, b_hh, *, use_bf16=True):
    """x: [B, T, D], mask: [B, T] (0/1 prefix mask). Returns [B, T, H] f32."""
    B, T, D = x.shape
    H = w_hh.shape[0]

    # --- padded / blocked sizes --------------------------------------------
    HP = _round_up(H, 128)                 # lane-dense hidden width
    TP0 = _round_up(T, 8)
    T_CHUNK = min(TP0, 32)                 # timesteps per grid step (unrolled)
    TP = _round_up(TP0, T_CHUNK)
    B_BLK = min(_round_up(B, 8), 128)      # sublane-/MXU-friendly batch block
    BP = _round_up(B, B_BLK)

    f32 = jnp.float32
    cd = jnp.bfloat16 if use_bf16 else f32  # MXU operand dtype (bf16 on v6e/v7x)

    # --- zero-pad operands (keeps padded hidden lanes / batch rows at 0) ----
    x_p = jnp.pad(x.astype(f32), ((0, BP - B), (0, TP - T), (0, 0)))
    wih_t = jnp.pad(jnp.transpose(w_ih).astype(f32), ((0, 0), (0, HP - H)))          # (D, HP)
    whh_t = jnp.pad(jnp.transpose(w_hh).astype(f32), ((0, HP - H), (0, HP - H)))     # (HP, HP)
    bias = jnp.pad((b_ih + b_hh).astype(f32), (0, HP - H))                           # (HP,)

    lengths = jnp.sum(mask.astype(jnp.int32), axis=1)                                # (B,)
    lens_p = jnp.pad(lengths, (0, BP - B)).reshape(BP, 1).astype(jnp.int32)          # (BP, 1)

    # --- hoisted input projection: one big parallel matmul at full MXU rate --
    proj = jnp.einsum("btd,dh->bth", x_p.astype(cd), wih_t.astype(cd),
                      preferred_element_type=f32)
    proj = (proj + bias[None, None, :]).astype(f32)                                  # (BP, TP, HP)

    whh_c = whh_t.astype(cd)

    grid = (BP // B_BLK, TP // T_CHUNK)

    out = pl.pallas_call(
        rnn_chunk_kernel,
        out_shape=jax.ShapeDtypeStruct((BP, TP, HP), f32),
        grid_spec=pltpu.PrefetchScalarGridSpec(
            num_scalar_prefetch=0,
            grid=grid,
            in_specs=[
                # streamed projection chunk (time indexed via BlockSpec; no
                # wrapper transpose).  If the DMA were still exposed at large
                # shapes, pipeline_mode=pl.Buffered(3) would deepen it.
                pl.BlockSpec((B_BLK, T_CHUNK, HP), lambda b, c: (b, c, 0)),
                # grid-invariant weights: block index never changes, so Pallas
                # skips the re-DMA.  (pl.Buffered(1) could also drop the
                # redundant second weight buffer — matters most on v7x 64 MiB.)
                pl.BlockSpec((HP, HP), lambda b, c: (0, 0)),
                pl.BlockSpec((B_BLK, 1), lambda b, c: (b, 0)),
            ],
            out_specs=pl.BlockSpec((B_BLK, T_CHUNK, HP), lambda b, c: (b, c, 0)),
            scratch_shapes=[pltpu.VMEM((B_BLK, HP), f32)],
        ),
        compiler_params=pltpu.CompilerParams(
            # batch blocks are independent -> "parallel" (v7x megacore split);
            # the time-chunk axis carries the recurrence -> "arbitrary".
            dimension_semantics=("parallel", "arbitrary"),
            # sized against v7x's 64 MiB VMEM with headroom
            vmem_limit_bytes=48 * 1024 * 1024,
        ),
    )(proj, whh_c, lens_p)

    return out[:B, :T, :H]


def rnn_wrapper_reference(x, mask, w_ih, w_hh, b_ih, b_hh):
    """Pure-JAX f32 reference (lax.scan) with identical semantics."""
    B, T, D = x.shape
    H = w_hh.shape[0]
    wih_t, whh_t = w_ih.T, w_hh.T
    bias = b_ih + b_hh

    def step(h, inp):
        x_t, m_t = inp                                        # [B, D], [B]
        h_new = jnp.tanh(x_t @ wih_t + h @ whh_t + bias)      # [B, H]
        m = m_t[:, None]
        h_next = jnp.where(m > 0, h_new, h)
        return h_next, h_new * m

    h0 = jnp.zeros((B, H), jnp.float32)
    _, out_tm = jax.lax.scan(
        step, h0,
        (jnp.transpose(x, (1, 0, 2)), jnp.transpose(mask.astype(jnp.float32))))
    return jnp.transpose(out_tm, (1, 0, 2))


if __name__ == "__main__":
    B, T, D, H = 2, 8, 16, 32

    key = jax.random.PRNGKey(0)
    k_x, k_wih, k_whh, k_bih, k_bhh = jax.random.split(key, 5)

    x = jax.random.normal(k_x, (B, T, D), dtype=jnp.float32)

    lengths = jnp.array([8, 5], dtype=jnp.int32)              # per-batch valid lengths
    mask = (jnp.arange(T)[None, :] < lengths[:, None]).astype(jnp.float32)  # [B, T]

    # Deterministic parameter init, matching nn.RNN shapes: U(-1/sqrt(H), 1/sqrt(H))
    bound = 1.0 / np.sqrt(H)
    w_ih = jax.random.uniform(k_wih, (H, D), jnp.float32, -bound, bound)
    w_hh = jax.random.uniform(k_whh, (H, H), jnp.float32, -bound, bound)
    b_ih = jax.random.uniform(k_bih, (H,), jnp.float32, -bound, bound)
    b_hh = jax.random.uniform(k_bhh, (H,), jnp.float32, -bound, bound)

    ref = rnn_wrapper_reference(x, mask, w_ih, w_hh, b_ih, b_hh)

    # f32 MXU operands: tight check against the f32 reference.
    out_f32 = jax.block_until_ready(
        rnn_wrapper_forward(x, mask, w_ih, w_hh, b_ih, b_hh, use_bf16=False))
    np.testing.assert_allclose(np.asarray(out_f32), np.asarray(ref),
                               atol=1e-4, rtol=1e-4)

    # bf16 MXU operands (v6e/v7x fast path), f32 accumulation/elementwise.
    out_bf16 = jax.block_until_ready(
        rnn_wrapper_forward(x, mask, w_ih, w_hh, b_ih, b_hh, use_bf16=True))
    np.testing.assert_allclose(np.asarray(out_bf16), np.asarray(ref),
                               atol=5e-2, rtol=5e-2)

    print("KERNEL_OK")
</pallas_src>

<mosaic_0001>
module attributes {stable_mosaic.version = 11 : i64} {
  func.func @rnn_chunk_kernel(%arg0: i32, %arg1: i32, %arg2: memref<8x8x128xf32, #tpu.memory_space<vmem>>, %arg3: memref<128x128xf32, #tpu.memory_space<vmem>>, %arg4: memref<8x1xi32, #tpu.memory_space<vmem>>, %arg5: memref<8x8x128xf32, #tpu.memory_space<vmem>>, %arg6: memref<8x128xf32, #tpu.memory_space<vmem>>) attributes {dimension_semantics = [#tpu.dimension_semantics<parallel>, #tpu.dimension_semantics<arbitrary>], iteration_bounds = array<i64: 1, 1>, scalar_prefetch = 0 : i64, scratch_operands = 1 : i64, tpu.core_type = #tpu.core_type<tc>, window_params = [{transform_indices = @transform_0, window_bounds = array<i64: 8, 8, 128>}, {pipeline_mode = #tpu.pipeline_mode<synchronous>, transform_indices = @transform_1, window_bounds = array<i64: 128, 128>}, {transform_indices = @transform_2, window_bounds = array<i64: 8, 1>}, {transform_indices = @transform_3, window_bounds = array<i64: 8, 8, 128>}]} {
    %c0_i32 = arith.constant 0 : i32
    %0 = arith.cmpi eq, %arg1, %c0_i32 : i32
    %1 = arith.extui %0 : i1 to i32
    %c0_i32_0 = arith.constant 0 : i32
    %2 = arith.cmpi ne, %1, %c0_i32_0 : i32
    scf.if %2 {
      %cst_44 = arith.constant 0.000000e+00 : f32
      %153 = vector.broadcast %cst_44 : f32 to vector<8x128xf32>
      %c0_45 = arith.constant 0 : index
      %c0_46 = arith.constant 0 : index
      %154 = vector.load %arg6[%c0_45, %c0_46] : memref<8x128xf32, #tpu.memory_space<vmem>>, vector<8x128xf32>
      tpu.vector_store %arg6[%c0_45, %c0_46], %153 {strides = array<i32>} : memref<8x128xf32, #tpu.memory_space<vmem>>, vector<8x128xf32>,
    } else {
    }
    %c0 = arith.constant 0 : index
    %c0_1 = arith.constant 0 : index
    %c0_2 = arith.constant 0 : index
    %3 = vector.load %arg2[%c0, %c0_1, %c0_2] : memref<8x8x128xf32, #tpu.memory_space<vmem>>, vector<8x8x128xf32>
    %c0_3 = arith.constant 0 : index
    %c0_4 = arith.constant 0 : index
    %4 = vector.load %arg3[%c0_3, %c0_4] : memref<128x128xf32, #tpu.memory_space<vmem>>, vector<128x128xf32>
    %c0_5 = arith.constant 0 : index
    %c0_6 = arith.constant 0 : index
    %5 = vector.load %arg4[%c0_5, %c0_6] : memref<8x1xi32, #tpu.memory_space<vmem>>, vector<8x1xi32>
    %c0_7 = arith.constant 0 : index
    %c0_8 = arith.constant 0 : index
    %6 = vector.load %arg6[%c0_7, %c0_8] : memref<8x128xf32, #tpu.memory_space<vmem>>, vector<8x128xf32>
    %c8_i32 = arith.constant 8 : i32
    %7 = arith.muli %arg1, %c8_i32 : i32
    %8 = vector.extract_strided_slice %3 {offsets = [0, 0, 0], sizes = [8, 1, 128], strides = [1, 1, 1]} : vector<8x8x128xf32> to vector<8x1x128xf32>
    %9 = vector.shape_cast %8 : vector<8x1x128xf32> to vector<8x128xf32>
    %cst = arith.constant dense<0.000000e+00> : vector<8x128xf32>
    %10 = tpu.matmul %6, %4, %cst {dimension_numbers = #tpu.dot_dimension_numbers<[1], [0], [0], [1], [0, 0, 1, 1], [], []>} : vector<8x128xf32>, vector<128x128xf32>, vector<8x128xf32> -> vector<8x128xf32>
    %11 = arith.addf %9, %10 : vector<8x128xf32>
    %12 = math.tanh %11 : vector<8x128xf32>
    %c0_i32_9 = arith.constant 0 : i32
    %13 = arith.addi %7, %c0_i32_9 : i32
    %14 = vector.broadcast %13 : i32 to vector<8x1xi32>
    %15 = arith.cmpi sgt, %5, %14 : vector<8x1xi32>
    %16 = vector.shape_cast %15 : vector<8x1xi1> to vector<8x1xi1>
    %17 = vector.broadcast %16 : vector<8x1xi1> to vector<8x128xi1>
    %18 = arith.select %17, %12, %6 : vector<8x128xi1>, vector<8x128xf32>
    %cst_10 = arith.constant 0.000000e+00 : f32
    %19 = vector.shape_cast %15 : vector<8x1xi1> to vector<8x1xi1>
    %20 = vector.broadcast %19 : vector<8x1xi1> to vector<8x128xi1>
    %21 = vector.broadcast %cst_10 : f32 to vector<8x128xf32>
    %22 = arith.select %20, %12, %21 : vector<8x128xi1>, vector<8x128xf32>
    %c0_11 = arith.constant 0 : index
    %c0_12 = arith.constant 0 : index
    %c0_13 = arith.constant 0 : index
    %23 = vector.load %arg5[%c0_11, %c0_12, %c0_13] : memref<8x8x128xf32, #tpu.memory_space<vmem>>, vector<8x1x128xf32>
    %24 = vector.shape_cast %23 : vector<8x1x128xf32> to vector<8x128xf32>
    %25 = vector.shape_cast %22 : vector<8x128xf32> to vector<8x1x128xf32>
    tpu.vector_store %arg5[%c0_11, %c0_12, %c0_13], %25 {strides = array<i32>} : memref<8x8x128xf32, #tpu.memory_space<vmem>>, vector<8x1x128xf32>,
    %26 = vector.extract_strided_slice %3 {offsets = [0, 1, 0], sizes = [8, 1, 128], strides = [1, 1, 1]} : vector<8x8x128xf32> to vector<8x1x128xf32>
    %27 = vector.shape_cast %26 : vector<8x1x128xf32> to vector<8x128xf32>
    %cst_14 = arith.constant dense<0.000000e+00> : vector<8x128xf32>
    %28 = tpu.matmul %18, %4, %cst_14 {dimension_numbers = #tpu.dot_dimension_numbers<[1], [0], [0], [1], [0, 0, 1, 1], [], []>} : vector<8x128xf32>, vector<128x128xf32>, vector<8x128xf32> -> vector<8x128xf32>
    %29 = arith.addf %27, %28 : vector<8x128xf32>
    %30 = math.tanh %29 : vector<8x128xf32>
    %c1_i32 = arith.constant 1 : i32
    %31 = arith.addi %7, %c1_i32 : i32
    %32 = vector.broadcast %31 : i32 to vector<8x1xi32>
    %33 = arith.cmpi sgt, %5, %32 : vector<8x1xi32>
    %34 = vector.shape_cast %33 : vector<8x1xi1> to vector<8x1xi1>
    %35 = vector.broadcast %34 : vector<8x1xi1> to vector<8x128xi1>
    %36 = arith.select %35, %30, %18 : vector<8x128xi1>, vector<8x128xf32>
    %cst_15 = arith.constant 0.000000e+00 : f32
    %37 = vector.shape_cast %33 : vector<8x1xi1> to vector<8x1xi1>
    %38 = vector.broadcast %37 : vector<8x1xi1> to vector<8x128xi1>
    %39 = vector.broadcast %cst_15 : f32 to vector<8x128xf32>
    %40 = arith.select %38, %30, %39 : vector<8x128xi1>, vector<8x128xf32>
    %c0_16 = arith.constant 0 : index
    %c1 = arith.constant 1 : index
    %c0_17 = arith.constant 0 : index
    %41 = vector.load %arg5[%c0_16, %c1, %c0_17] : memref<8x8x128xf32, #tpu.memory_space<vmem>>, vector<8x1x128xf32>
    %42 = vector.shape_cast %41 : vector<8x1x128xf32> to vector<8x128xf32>
    %43 = vector.shape_cast %40 : vector<8x128xf32> to vector<8x1x128xf32>
    tpu.vector_store %arg5[%c0_16, %c1, %c0_17], %43 {strides = array<i32>} : memref<8x8x128xf32, #tpu.memory_space<vmem>>, vector<8x1x128xf32>,
    %44 = vector.extract_strided_slice %3 {offsets = [0, 2, 0], sizes = [8, 1, 128], strides = [1, 1, 1]} : vector<8x8x128xf32> to vector<8x1x128xf32>
    %45 = vector.shape_cast %44 : vector<8x1x128xf32> to vector<8x128xf32>
    %cst_18 = arith.constant dense<0.000000e+00> : vector<8x128xf32>
    %46 = tpu.matmul %36, %4, %cst_18 {dimension_numbers = #tpu.dot_dimension_numbers<[1], [0], [0], [1], [0, 0, 1, 1], [], []>} : vector<8x128xf32>, vector<128x128xf32>, vector<8x128xf32> -> vector<8x128xf32>
    %47 = arith.addf %45, %46 : vector<8x128xf32>
    %48 = math.tanh %47 : vector<8x128xf32>
    %c2_i32 = arith.constant 2 : i32
    %49 = arith.addi %7, %c2_i32 : i32
    %50 = vector.broadcast %49 : i32 to vector<8x1xi32>
    %51 = arith.cmpi sgt, %5, %50 : vector<8x1xi32>
    %52 = vector.shape_cast %51 : vector<8x1xi1> to vector<8x1xi1>
    %53 = vector.broadcast %52 : vector<8x1xi1> to vector<8x128xi1>
    %54 = arith.select %53, %48, %36 : vector<8x128xi1>, vector<8x128xf32>
    %cst_19 = arith.constant 0.000000e+00 : f32
    %55 = vector.shape_cast %51 : vector<8x1xi1> to vector<8x1xi1>
    %56 = vector.broadcast %55 : vector<8x1xi1> to vector<8x128xi1>
    %57 = vector.broadcast %cst_19 : f32 to vector<8x128xf32>
    %58 = arith.select %56, %48, %57 : vector<8x128xi1>, vector<8x128xf32>
    %c0_20 = arith.constant 0 : index
    %c2 = arith.constant 2 : index
    %c0_21 = arith.constant 0 : index
    %59 = vector.load %arg5[%c0_20, %c2, %c0_21] : memref<8x8x128xf32, #tpu.memory_space<vmem>>, vector<8x1x128xf32>
    %60 = vector.shape_cast %59 : vector<8x1x128xf32> to vector<8x128xf32>
    %61 = vector.shape_cast %58 : vector<8x128xf32> to vector<8x1x128xf32>
    tpu.vector_store %arg5[%c0_20, %c2, %c0_21], %61 {strides = array<i32>} : memref<8x8x128xf32, #tpu.memory_space<vmem>>, vector<8x1x128xf32>,
    %62 = vector.extract_strided_slice %3 {offsets = [0, 3, 0], sizes = [8, 1, 128], strides = [1, 1, 1]} : vector<8x8x128xf32> to vector<8x1x128xf32>
    %63 = vector.shape_cast %62 : vector<8x1x128xf32> to vector<8x128xf32>
    %cst_22 = arith.constant dense<0.000000e+00> : vector<8x128xf32>
    %64 = tpu.matmul %54, %4, %cst_22 {dimension_numbers = #tpu.dot_dimension_numbers<[1], [0], [0], [1], [0, 0, 1, 1], [], []>} : vector<8x128xf32>, vector<128x128xf32>, vector<8x128xf32> -> vector<8x128xf32>
    %65 = arith.addf %63, %64 : vector<8x128xf32>
    %66 = math.tanh %65 : vector<8x128xf32>
    %c3_i32 = arith.constant 3 : i32
    %67 = arith.addi %7, %c3_i32 : i32
    %68 = vector.broadcast %67 : i32 to vector<8x1xi32>
    %69 = arith.cmpi sgt, %5, %68 : vector<8x1xi32>
    %70 = vector.shape_cast %69 : vector<8x1xi1> to vector<8x1xi1>
    %71 = vector.broadcast %70 : vector<8x1xi1> to vector<8x128xi1>
    %72 = arith.select %71, %66, %54 : vector<8x128xi1>, vector<8x128xf32>
    %cst_23 = arith.constant 0.000000e+00 : f32
    %73 = vector.shape_cast %69 : vector<8x1xi1> to vector<8x1xi1>
    %74 = vector.broadcast %73 : vector<8x1xi1> to vector<8x128xi1>
    %75 = vector.broadcast %cst_23 : f32 to vector<8x128xf32>
    %76 = arith.select %74, %66, %75 : vector<8x128xi1>, vector<8x128xf32>
    %c0_24 = arith.constant 0 : index
    %c3 = arith.constant 3 : index
    %c0_25 = arith.constant 0 : index
    %77 = vector.load %arg5[%c0_24, %c3, %c0_25] : memref<8x8x128xf32, #tpu.memory_space<vmem>>, vector<8x1x128xf32>
    %78 = vector.shape_cast %77 : vector<8x1x128xf32> to vector<8x128xf32>
    %79 = vector.shape_cast %76 : vector<8x128xf32> to vector<8x1x128xf32>
    tpu.vector_store %arg5[%c0_24, %c3, %c0_25], %79 {strides = array<i32>} : memref<8x8x128xf32, #tpu.memory_space<vmem>>, vector<8x1x128xf32>,
    %80 = vector.extract_strided_slice %3 {offsets = [0, 4, 0], sizes = [8, 1, 128], strides = [1, 1, 1]} : vector<8x8x128xf32> to vector<8x1x128xf32>
    %81 = vector.shape_cast %80 : vector<8x1x128xf32> to vector<8x128xf32>
    %cst_26 = arith.constant dense<0.000000e+00> : vector<8x128xf32>
    %82 = tpu.matmul %72, %4, %cst_26 {dimension_numbers = #tpu.dot_dimension_numbers<[1], [0], [0], [1], [0, 0, 1, 1], [], []>} : vector<8x128xf32>, vector<128x128xf32>, vector<8x128xf32> -> vector<8x128xf32>
    %83 = arith.addf %81, %82 : vector<8x128xf32>
    %84 = math.tanh %83 : vector<8x128xf32>
    %c4_i32 = arith.constant 4 : i32
    %85 = arith.addi %7, %c4_i32 : i32
    %86 = vector.broadcast %85 : i32 to vector<8x1xi32>
    %87 = arith.cmpi sgt, %5, %86 : vector<8x1xi32>
    %88 = vector.shape_cast %87 : vector<8x1xi1> to vector<8x1xi1>
    %89 = vector.broadcast %88 : vector<8x1xi1> to vector<8x128xi1>
    %90 = arith.select %89, %84, %72 : vector<8x128xi1>, vector<8x128xf32>
    %cst_27 = arith.constant 0.000000e+00 : f32
    %91 = vector.shape_cast %87 : vector<8x1xi1> to vector<8x1xi1>
    %92 = vector.broadcast %91 : vector<8x1xi1> to vector<8x128xi1>
    %93 = vector.broadcast %cst_27 : f32 to vector<8x128xf32>
    %94 = arith.select %92, %84, %93 : vector<8x128xi1>, vector<8x128xf32>
    %c0_28 = arith.constant 0 : index
    %c4 = arith.constant 4 : index
    %c0_29 = arith.constant 0 : index
    %95 = vector.load %arg5[%c0_28, %c4, %c0_29] : memref<8x8x128xf32, #tpu.memory_space<vmem>>, vector<8x1x128xf32>
    %96 = vector.shape_cast %95 : vector<8x1x128xf32> to vector<8x128xf32>
    %97 = vector.shape_cast %94 : vector<8x128xf32> to vector<8x1x128xf32>
    tpu.vector_store %arg5[%c0_28, %c4, %c0_29], %97 {strides = array<i32>} : memref<8x8x128xf32, #tpu.memory_space<vmem>>, vector<8x1x128xf32>,
    %98 = vector.extract_strided_slice %3 {offsets = [0, 5, 0], sizes = [8, 1, 128], strides = [1, 1, 1]} : vector<8x8x128xf32> to vector<8x1x128xf32>
    %99 = vector.shape_cast %98 : vector<8x1x128xf32> to vector<8x128xf32>
    %cst_30 = arith.constant dense<0.000000e+00> : vector<8x128xf32>
    %100 = tpu.matmul %90, %4, %cst_30 {dimension_numbers = #tpu.dot_dimension_numbers<[1], [0], [0], [1], [0, 0, 1, 1], [], []>} : vector<8x128xf32>, vector<128x128xf32>, vector<8x128xf32> -> vector<8x128xf32>
    %101 = arith.addf %99, %100 : vector<8x128xf32>
    %102 = math.tanh %101 : vector<8x128xf32>
    %c5_i32 = arith.constant 5 : i32
    %103 = arith.addi %7, %c5_i32 : i32
    %104 = vector.broadcast %103 : i32 to vector<8x1xi32>
    %105 = arith.cmpi sgt, %5, %104 : vector<8x1xi32>
    %106 = vector.shape_cast %105 : vector<8x1xi1> to vector<8x1xi1>
    %107 = vector.broadcast %106 : vector<8x1xi1> to vector<8x128xi1>
    %108 = arith.select %107, %102, %90 : vector<8x128xi1>, vector<8x128xf32>
    %cst_31 = arith.constant 0.000000e+00 : f32
    %109 = vector.shape_cast %105 : vector<8x1xi1> to vector<8x1xi1>
    %110 = vector.broadcast %109 : vector<8x1xi1> to vector<8x128xi1>
    %111 = vector.broadcast %cst_31 : f32 to vector<8x128xf32>
    %112 = arith.select %110, %102, %111 : vector<8x128xi1>, vector<8x128xf32>
    %c0_32 = arith.constant 0 : index
    %c5 = arith.constant 5 : index
    %c0_33 = arith.constant 0 : index
    %113 = vector.load %arg5[%c0_32, %c5, %c0_33] : memref<8x8x128xf32, #tpu.memory_space<vmem>>, vector<8x1x128xf32>
    %114 = vector.shape_cast %113 : vector<8x1x128xf32> to vector<8x128xf32>
    %115 = vector.shape_cast %112 : vector<8x128xf32> to vector<8x1x128xf32>
    tpu.vector_store %arg5[%c0_32, %c5, %c0_33], %115 {strides = array<i32>} : memref<8x8x128xf32, #tpu.memory_space<vmem>>, vector<8x1x128xf32>,
    %116 = vector.extract_strided_slice %3 {offsets = [0, 6, 0], sizes = [8, 1, 128], strides = [1, 1, 1]} : vector<8x8x128xf32> to vector<8x1x128xf32>
    %117 = vector.shape_cast %116 : vector<8x1x128xf32> to vector<8x128xf32>
    %cst_34 = arith.constant dense<0.000000e+00> : vector<8x128xf32>
    %118 = tpu.matmul %108, %4, %cst_34 {dimension_numbers = #tpu.dot_dimension_numbers<[1], [0], [0], [1], [0, 0, 1, 1], [], []>} : vector<8x128xf32>, vector<128x128xf32>, vector<8x128xf32> -> vector<8x128xf32>
    %119 = arith.addf %117, %118 : vector<8x128xf32>
    %120 = math.tanh %119 : vector<8x128xf32>
    %c6_i32 = arith.constant 6 : i32
    %121 = arith.addi %7, %c6_i32 : i32
    %122 = vector.broadcast %121 : i32 to vector<8x1xi32>
    %123 = arith.cmpi sgt, %5, %122 : vector<8x1xi32>
    %124 = vector.shape_cast %123 : vector<8x1xi1> to vector<8x1xi1>
    %125 = vector.broadcast %124 : vector<8x1xi1> to vector<8x128xi1>
    %126 = arith.select %125, %120, %108 : vector<8x128xi1>, vector<8x128xf32>
    %cst_35 = arith.constant 0.000000e+00 : f32
    %127 = vector.shape_cast %123 : vector<8x1xi1> to vector<8x1xi1>
    %128 = vector.broadcast %127 : vector<8x1xi1> to vector<8x128xi1>
    %129 = vector.broadcast %cst_35 : f32 to vector<8x128xf32>
    %130 = arith.select %128, %120, %129 : vector<8x128xi1>, vector<8x128xf32>
    %c0_36 = arith.constant 0 : index
    %c6 = arith.constant 6 : index
    %c0_37 = arith.constant 0 : index
    %131 = vector.load %arg5[%c0_36, %c6, %c0_37] : memref<8x8x128xf32, #tpu.memory_space<vmem>>, vector<8x1x128xf32>
    %132 = vector.shape_cast %131 : vector<8x1x128xf32> to vector<8x128xf32>
    %133 = vector.shape_cast %130 : vector<8x128xf32> to vector<8x1x128xf32>
    tpu.vector_store %arg5[%c0_36, %c6, %c0_37], %133 {strides = array<i32>} : memref<8x8x128xf32, #tpu.memory_space<vmem>>, vector<8x1x128xf32>,
    %134 = vector.extract_strided_slice %3 {offsets = [0, 7, 0], sizes = [8, 1, 128], strides = [1, 1, 1]} : vector<8x8x128xf32> to vector<8x1x128xf32>
    %135 = vector.shape_cast %134 : vector<8x1x128xf32> to vector<8x128xf32>
    %cst_38 = arith.constant dense<0.000000e+00> : vector<8x128xf32>
    %136 = tpu.matmul %126, %4, %cst_38 {dimension_numbers = #tpu.dot_dimension_numbers<[1], [0], [0], [1], [0, 0, 1, 1], [], []>} : vector<8x128xf32>, vector<128x128xf32>, vector<8x128xf32> -> vector<8x128xf32>
    %137 = arith.addf %135, %136 : vector<8x128xf32>
    %138 = math.tanh %137 : vector<8x128xf32>
    %c7_i32 = arith.constant 7 : i32
    %139 = arith.addi %7, %c7_i32 : i32
    %140 = vector.broadcast %139 : i32 to vector<8x1xi32>
    %141 = arith.cmpi sgt, %5, %140 : vector<8x1xi32>
    %142 = vector.shape_cast %141 : vector<8x1xi1> to vector<8x1xi1>
    %143 = vector.broadcast %142 : vector<8x1xi1> to vector<8x128xi1>
    %144 = arith.select %143, %138, %126 : vector<8x128xi1>, vector<8x128xf32>
    %cst_39 = arith.constant 0.000000e+00 : f32
    %145 = vector.shape_cast %141 : vector<8x1xi1> to vector<8x1xi1>
    %146 = vector.broadcast %145 : vector<8x1xi1> to vector<8x128xi1>
    %147 = vector.broadcast %cst_39 : f32 to vector<8x128xf32>
    %148 = arith.select %146, %138, %147 : vector<8x128xi1>, vector<8x128xf32>
    %c0_40 = arith.constant 0 : index
    %c7 = arith.constant 7 : index
    %c0_41 = arith.constant 0 : index
    %149 = vector.load %arg5[%c0_40, %c7, %c0_41] : memref<8x8x128xf32, #tpu.memory_space<vmem>>, vector<8x1x128xf32>
    %150 = vector.shape_cast %149 : vector<8x1x128xf32> to vector<8x128xf32>
    %151 = vector.shape_cast %148 : vector<8x128xf32> to vector<8x1x128xf32>
    tpu.vector_store %arg5[%c0_40, %c7, %c0_41], %151 {strides = array<i32>} : memref<8x8x128xf32, #tpu.memory_space<vmem>>, vector<8x1x128xf32>,
    %c0_42 = arith.constant 0 : index
    %c0_43 = arith.constant 0 : index
    %152 = vector.load %arg6[%c0_42, %c0_43] : memref<8x128xf32, #tpu.memory_space<vmem>>, vector<8x128xf32>
    tpu.vector_store %arg6[%c0_42, %c0_43], %144 {strides = array<i32>} : memref<8x128xf32, #tpu.memory_space<vmem>>, vector<8x128xf32>,
    return
  }
  func.func @transform_0(%arg0: i32, %arg1: i32) -> (i32, i32, i32) {
    %c0_i32 = arith.constant 0 : i32
    %c0_i32_0 = arith.constant 0 : i32
    return %arg0, %arg1, %c0_i32 : i32, i32, i32
  }
  func.func @transform_1(%arg0: i32, %arg1: i32) -> (i32, i32) {
    %c0_i32 = arith.constant 0 : i32
    %c0_i32_0 = arith.constant 0 : i32
    %c0_i32_1 = arith.constant 0 : i32
    return %c0_i32, %c0_i32_0 : i32, i32
  }
  func.func @transform_2(%arg0: i32, %arg1: i32) -> (i32, i32) {
    %c0_i32 = arith.constant 0 : i32
    %c0_i32_0 = arith.constant 0 : i32
    return %arg0, %c0_i32 : i32, i32
  }
  func.func @transform_3(%arg0: i32, %arg1: i32) -> (i32, i32, i32) {
    %c0_i32 = arith.constant 0 : i32
    %c0_i32_0 = arith.constant 0 : i32
    return %arg0, %arg1, %c0_i32 : i32, i32, i32
  }
}

</mosaic_0001>

<bundles_post_ra>
// kernel: tpu_custom_call.1
= control target key start
LH: loop header
LB: loop body
LE: loop exit
PB: predicated region body
PF: predicated region fallthrough
CT: control target
= control target key end

     0   :  { %8 = vsyncpa [#allocation4], 0  ;;  %s3056_s0 = inlined_call_operand.hbm [shape: f32[8,8,128], index: 0, kind: input, shape index: {}]   ;;  %s3057_s1 = inlined_call_operand.hbm [shape: f32[128,128], index: 1, kind: input, shape index: {}]   ;;  %s3058_s2 = inlined_call_operand.vmem [shape: s32[8,1], index: 2, kind: input, shape index: {}]   ;;  %s3059_s3 = inlined_call_operand.hbm [shape: f32[8,8,128], index: 3, kind: output, shape index: {}]  }
   0x1   :  { %9 = vsyncpa [#allocation7], 0 }
   0x2   :  { %10 = vsyncpa [#allocation5], 0  ;;  %s2569_s12 = smov [#allocation3]   ;;  %s2497_s16 = scalar_lea.hbm %s3056_s0, 1024 }
   0x3   :  { %s16_s13 = sshll.u32 %s2569_s12, 4  ;;  %p2498_p0 = scmp.ne.s32.totalorder %s3056_s0, %s2497_s16  ;;  %s17_s13 = int_to_ptr.vmem [resolvable:$true] %s16_s13 }
   0x4   :  { %p2501_p1 = scmp.lt.u32.totalorder %s2497_s16, %s3056_s0 }
   0x6   :  { %p2503_p2 = pnand %p2501_p1, %p2498_p0 }
   0x8   :  { %2506 = shalt.err (!%p2503_p2)
}
   0x9   :  { %s2507_s21 = scalar_lea.vmem %s17_s13, 1024  ;;  %p2512_p4 = scmp.lt.s32.totalorder %s17_s13, %s17_s13 }
   0xa   :  { %p2508_p3 = scmp.ne.s32.totalorder %s17_s13, %s2507_s21  ;;  %p2513_p5 = scmp.lt.s32.totalorder %s2507_s21, %s2507_s21 }
   0xc   :  { %p2514_p6 = por %p2513_p5, %p2512_p4 }
   0xe   :  { %p2515_p7 = pnand %p2514_p6, %p2508_p3 }
  0x10   :  { %2518 = shalt.err (!%p2515_p7)
}
  0x11   :  { %s2570_s22 = smov 128   ;;  %s2571_s23 = smov 8  }
  0x12   :  { %22 = dma.hbm_to_vmem [thread:$0]  %s3056_s0, 1024, %s17_s13, [#allocation4], %s2570_s22, %s2570_s22, %s2571_s23  }
  0x13   :  { %s2572_s26 = smov [#allocation6]   ;;  %s2519_s30 = scalar_lea.hbm %s3057_s1, 2048 }
  0x14   :  { %s28_s27 = sshll.u32 %s2572_s26, 4  ;;  %p2520_p8 = scmp.ne.s32.totalorder %s3057_s1, %s2519_s30  ;;  %s29_s27 = int_to_ptr.vmem [resolvable:$true] %s28_s27 }
  0x15   :  { %p2523_p9 = scmp.lt.u32.totalorder %s2519_s30, %s3057_s1 }
  0x17   :  { %p2525_p10 = pnand %p2523_p9, %p2520_p8 }
  0x19   :  { %2528 = shalt.err (!%p2525_p10)
}
  0x1a   :  { %s2529_s8 = scalar_lea.vmem %s29_s27, 2048  ;;  %p2534_p12 = scmp.lt.s32.totalorder %s29_s27, %s29_s27 }
  0x1b   :  { %p2530_p11 = scmp.ne.s32.totalorder %s29_s27, %s2529_s8  ;;  %p2535_p13 = scmp.lt.s32.totalorder %s2529_s8, %s2529_s8 }
  0x1d   :  { %p2536_p0 = por %p2535_p13, %p2534_p12 }
  0x1f   :  { %p2537_p1 = pnand %p2536_p0, %p2530_p11 }
  0x21   :  { %2540 = shalt.err (!%p2537_p1)
}
  0x22   :  { %34 = dma.hbm_to_vmem [thread:$0]  %s3057_s1, 2048, %s29_s27, [#allocation7], %s2570_s22, %s2570_s22, %s2571_s23  }
  0x23   :  { %2563 = dma.done.wait [#allocation4], 1024  }
  0x24   :  { %2564 = vsyncadd [#allocation4], 4294966272 }
  0x25   :  { %2565 = dma.done.wait [#allocation7], 2048  }
  0x26   :  { %2566 = vsyncadd [#allocation7], 4294965248  ;;  %v2573_v0 = vmov 0.0|0.0   ;;  %vm2574_vm0 = vmmov 0   ;;  %v2575_v1 = vmov 0.0   ;;  %v2576_v2 = vmov 0  }
  0x27   :  { %2157 = vmatprep.subr.bf16.mxu0 %v2573_v0  ;;  %1909 = vmatprep.mubr.msk.f32.mxu0 %vm2574_vm0, %v2575_v1  ;;  %v56_v3 = vld [vmem:[#allocation6] sm:$0xff]  ;;  %v57_v4 = vld [vmem:[#allocation6 + $0x8] sm:$0xff]  ;;  %v58_v5 = vld [vmem:[#allocation6 + $0x10] sm:$0xff]  ;;  %v2577_v58 = vmov 1966171168   ;;  %v221_v60 = vlaneseq  ;;  %vm193_vm5 = vcmask 1041409  }
  0x28   :  { %2359 = vset.pattern.permute.xlu0 %v2576_v2  ;;  %2181 = vmatprep.subr.bf16.mxu1 %v2573_v0  ;;  %v2637_v6 = vpack.c.bf16 %v57_v4, %v56_v3  ;;  %v59_v7 = vld [vmem:[#allocation6 + $0x18] sm:$0xff]  ;;  %v60_v9 = vld [vmem:[#allocation6 + $0x20] sm:$0xff]  ;;  %v61_v10 = vld [vmem:[#allocation6 + $0x28] sm:$0xff]  ;;  %v219_v59 = vunpack.c.l.s4 %v2577_v58  ;;  %vm196_vm6 = vcmask 1042434   ;;  %vm199_vm7 = vcmask 1043459  }
  0x29   :  { %1944 = vmatprep.mubr.msk.f32.mxu1 %vm2574_vm0, %v2575_v1  ;;  %2360 = vset.pattern.permute.xlu1 %v2576_v2  ;;  %v2640_v8 = vpack.c.bf16 %v59_v7, %v58_v5  ;;  %v2648_v11 = vld [vmem:[%s3058_s2] sm:$0xff]  ;;  %v2653_v12 = vpack.c.bf16 %v61_v10, %v60_v9  ;;  %v62_v14 = vld [vmem:[#allocation6 + $0x30] sm:$0xff]  ;;  %v63_v15 = vld [vmem:[#allocation6 + $0x38] sm:$0xff]  ;;  %vm202_vm8 = vcmask 1044484   ;;  %v222_v9 = vshrl.u32 %v221_v60, 7  ;;  %s2578_s2 = smov [#allocation8]  }
  0x2a   :  { %2159 = vmatpush3.bf16.msra.mxu0 %v2637_v6  ;;  %2183 = vmatpush3.bf16.msra.mxu1 %v2637_v6  ;;  %vm178_vm1 = vcmp.gt.s32.totalorder %v2648_v11, 0  ;;  %vm386_vm2 = vcmp.gt.s32.totalorder %v2648_v11, 1  ;;  %vm989_vm3 = vcmp.gt.s32.totalorder %v2648_v11, 4  ;;  %v2662_v17 = vpack.c.bf16 %v63_v15, %v62_v14  ;;  %v64_v18 = vld [vmem:[#allocation6 + $0x40] sm:$0xff]  ;;  %v65_v19 = vld [vmem:[#allocation6 + $0x48] sm:$0xff]  ;;  %v66_v22 = vld [vmem:[#allocation6 + $0x50] sm:$0xff] }
  0x2b   :  { %2160 = vmatprep.subr.bf16.mxu0 %v2573_v0  ;;  %2184 = vmatprep.subr.bf16.mxu1 %v2573_v0  ;;  %v179_v13 = vsel %vm178_vm1, 1, %v2576_v2  ;;  %v387_v16 = vsel %vm386_vm2, 1, %v2576_v2  ;;  %v990_v20 = vsel %vm989_vm3, 1, %v2576_v2  ;;  %vm1391_vm4 = vcmp.gt.s32.totalorder %v2648_v11, 6  ;;  %v67_v23 = vld [vmem:[#allocation6 + $0x58] sm:$0xff]  ;;  %v68_v26 = vld [vmem:[#allocation6 + $0x60] sm:$0xff] }
  0x2c   :  { %181 = vperm.xlu0 %2359, %v179_v13   ;;  %v2670_v21 = vpack.c.bf16 %v65_v19, %v64_v18  ;;  %v1392_v24 = vsel %vm1391_vm4, 1, %v2576_v2  ;;  %v2677_v25 = vpack.c.bf16 %v67_v23, %v66_v22  ;;  %v69_v27 = vld [vmem:[#allocation6 + $0x68] sm:$0xff]  ;;  %v70_v29 = vld [vmem:[#allocation6 + $0x70] sm:$0xff]  ;;  %v71_v30 = vld [vmem:[#allocation6 + $0x78] sm:$0xff]  ;;  %v220_v7 = vunpack.c.0.s8 %v219_v59  ;;  %s1695_s11 = sshll.u32 %s2578_s2, 4  ;;  %s1696_s11 = int_to_ptr.vmem [resolvable:$true] %s1695_s11 }
  0x2d   :  { %v2683_v28 = vpack.c.bf16 %v69_v27, %v68_v26  ;;  %v2689_v31 = vpack.c.bf16 %v71_v30, %v70_v29  ;;  %v2717_v32 = vld [vmem:[#allocation3] sm:$0xff]  ;;  %v2719_v33 = vld [vmem:[#allocation3 + $0x8] sm:$0xff]  ;;  %v2721_v35 = vld [vmem:[#allocation3 + $0x10] sm:$0xff]  ;;  %vm205_vm9 = vcmask 1045509   ;;  %vm208_vm10 = vcmask 1046534   ;;  %s2541_s12 = scalar_lea.vmem %s1696_s11, 1024  ;;  %p2546_p3 = scmp.lt.s32.totalorder %s1696_s11, %s1696_s11 }
  0x2e   :  { %2162 = vmatpush3.bf16.msra.mxu0 %v2640_v8  ;;  %2186 = vmatpush3.bf16.msra.mxu1 %v2640_v8  ;;  %v2723_v36 = vld [vmem:[#allocation3 + $0x18] sm:$0xff]  ;;  %v2726_v42 = vld [vmem:[#allocation3 + $0x20] sm:$0xff]  ;;  %v2728_v43 = vld [vmem:[#allocation3 + $0x28] sm:$0xff]  ;;  %vm211_vm11 = vcmask 1047559   ;;  %v2745_v27 = vsub.s32 %v220_v7, %v222_v9  ;;  %vm587_vm13 = vcmp.gt.s32.totalorder %v2648_v11, 2  ;;  %vm788_vm14 = vcmp.gt.s32.totalorder %v2648_v11, 3  ;;  %p2542_p2 = scmp.ne.s32.totalorder %s1696_s11, %s2541_s12  ;;  %p2547_p4 = scmp.lt.s32.totalorder %s2541_s12, %s2541_s12 }
  0x2f   :  { %2163 = vmatprep.subr.bf16.mxu0 %v2573_v0  ;;  %2187 = vmatprep.subr.bf16.mxu1 %v2573_v0  ;;  %v2731_v48 = vld [vmem:[#allocation3 + $0x30] sm:$0xff]  ;;  %v2735_v52 = vld [vmem:[#allocation3 + $0x38] sm:$0xff]  ;;  %vm1190_vm15 = vcmp.gt.s32.totalorder %v2648_v11, 5  ;;  %vm1592_vm1 = vcmp.gt.s32.totalorder %v2648_v11, 7 }
  0x30   :  { %389 = vperm.xlu0 %2359, %v387_v16   ;;  %v1191_v58 = vsel %vm1190_vm15, 1, %v2576_v2  ;;  %v1593_v59 = vsel %vm1592_vm1, 1, %v2576_v2  ;;  %p2548_p5 = por %p2547_p4, %p2546_p3 }
  0x32   :  { %2165 = vmatpush3.bf16.msra.mxu0 %v2653_v12  ;;  %2189 = vmatpush3.bf16.msra.mxu1 %v2653_v12  ;;  %p2549_p6 = pnand %p2548_p5, %p2542_p2 }
  0x33   :  { %2166 = vmatprep.subr.bf16.mxu0 %v2573_v0  ;;  %2190 = vmatprep.subr.bf16.mxu1 %v2573_v0 }
  0x34   :  { %992 = vperm.xlu0 %2359, %v990_v20  }
  0x36   :  { %2168 = vmatpush3.bf16.msra.mxu0 %v2662_v17  ;;  %2192 = vmatpush3.bf16.msra.mxu1 %v2662_v17 }
  0x37   :  { %2169 = vmatprep.subr.bf16.mxu0 %v2573_v0  ;;  %2193 = vmatprep.subr.bf16.mxu1 %v2573_v0 }
  0x38   :  { %1394 = vperm.xlu0 %2359, %v1392_v24  }
  0x3a   :  { %2171 = vmatpush3.bf16.msra.mxu0 %v2670_v21  ;;  %2195 = vmatpush3.bf16.msra.mxu1 %v2670_v21 }
  0x3b   :  { %2172 = vmatprep.subr.bf16.mxu0 %v2573_v0  ;;  %2196 = vmatprep.subr.bf16.mxu1 %v2573_v0 }
  0x3e   :  { %2174 = vmatpush3.bf16.msra.mxu0 %v2677_v25  ;;  %2198 = vmatpush3.bf16.msra.mxu1 %v2677_v25 }
  0x3f   :  { %2175 = vmatprep.subr.bf16.mxu0 %v2573_v0  ;;  %2199 = vmatprep.subr.bf16.mxu1 %v2573_v0 }
  0x42   :  { %2177 = vmatpush3.bf16.msra.mxu0 %v2683_v28  ;;  %2201 = vmatpush3.bf16.msra.mxu1 %v2683_v28 }
  0x43   :  { %2178 = vmatprep.subr.bf16.mxu0 %v2573_v0  ;;  %2202 = vmatprep.subr.bf16.mxu1 %v2573_v0 }
  0x46   :  { %2180 = vmatpush3.bf16.msra.mxu0 %v2689_v31  ;;  %2204 = vmatpush3.bf16.msra.mxu1 %v2689_v31 }
  0x47   :  { %2205 = vmatprep.subr.bf16.mxu0 %v2573_v0  ;;  %2229 = vmatprep.subr.bf16.mxu1 %v2573_v0 }
  0x49   :  { %1910 = vmatmul.mubr.f32.vlgmr.msra.gmra.mrb[0].mxu0 %v2575_v1 }
  0x4a   :  { %2207 = vmatpush3.bf16.msra.mxu0 %v2637_v6  ;;  %1979 = vmatprep.mubr.msk.f32.mxu0 %vm2574_vm0, %v2575_v1 }
  0x4b   :  { %2208 = vmatprep.subr.bf16.mxu0 %v2573_v0 }
  0x4e   :  { %2210 = vmatpush3.bf16.msra.mxu0 %v2640_v8 }
  0x4f   :  { %2211 = vmatprep.subr.bf16.mxu0 %v2573_v0 }
  0x52   :  { %2213 = vmatpush3.bf16.msra.mxu0 %v2653_v12 }
  0x53   :  { %2214 = vmatprep.subr.bf16.mxu0 %v2573_v0 }
  0x56   :  { %2216 = vmatpush3.bf16.msra.mxu0 %v2662_v17 }
  0x57   :  { %2217 = vmatprep.subr.bf16.mxu0 %v2573_v0 }
  0x5a   :  { %2219 = vmatpush3.bf16.msra.mxu0 %v2670_v21 }
  0x5b   :  { %2220 = vmatprep.subr.bf16.mxu0 %v2573_v0 }
  0x5e   :  { %2222 = vmatpush3.bf16.msra.mxu0 %v2677_v25 }
  0x5f   :  { %2223 = vmatprep.subr.bf16.mxu0 %v2573_v0 }
  0x62   :  { %2225 = vmatpush3.bf16.msra.mxu0 %v2683_v28 }
  0x63   :  { %2226 = vmatprep.subr.bf16.mxu0 %v2573_v0 }
  0x66   :  { %2228 = vmatpush3.bf16.msra.mxu0 %v2689_v31 }
  0x67   :  { %2253 = vmatprep.subr.bf16.mxu0 %v2573_v0 }
  0xab   :  { %v182_v23 = vpop.permute.xlu0 %181 }
  0xac   :  { %vm183_vm12 = vcmp.eq.s32.totalorder %v182_v23, 1 }
 0x11c   :  { %v141_v34 = vpop.f32.mrb[0].mxu0 }
 0x11d   :  { %v146_v37 = vrot.slane %v141_v34, 1  ;;  %v147_v38 = vrot.slane %v141_v34, 2  ;;  %v148_v39 = vrot.slane %v141_v34, 3  ;;  %v161_v40 = vadd.f32 %v141_v34, %v2717_v32  ;;  %v1911_v41 = vpop.f32.mrb[1].mxu0 }
 0x11e   :  { %v149_v44 = vrot.slane %v141_v34, 4  ;;  %v150_v45 = vrot.slane %v141_v34, 5  ;;  %v151_v46 = vrot.slane %v141_v34, 6  ;;  %v152_v49 = vrot.slane %v141_v34, 7 }
 0x11f   :  { %v162_v47 = vadd.f32 %v146_v37, %v2719_v33  ;;  %v163_v50 = vadd.f32 %v147_v38, %v2721_v35  ;;  %v164_v51 = vadd.f32 %v148_v39, %v2723_v36  ;;  %2361 = vtanh.f32 %v161_v40 }
 0x120   :  { %v165_v53 = vadd.f32 %v149_v44, %v2726_v42  ;;  %v166_v54 = vadd.f32 %v150_v45, %v2728_v43  ;;  %v167_v55 = vadd.f32 %v151_v46, %v2731_v48  ;;  %v168_v56 = vadd.f32 %v152_v49, %v2735_v52 }
 0x121   :  { %2363 = vtanh.f32 %v162_v47 }
 0x122   :  { %2365 = vtanh.f32 %v163_v50 }
 0x123   :  { %2367 = vtanh.f32 %v164_v51 }
 0x124   :  { %2369 = vtanh.f32 %v165_v53 }
 0x125   :  { %2371 = vtanh.f32 %v166_v54 }
 0x126   :  { %2373 = vtanh.f32 %v167_v55 }
 0x127   :  { %2375 = vtanh.f32 %v168_v56  ;;  %v588_v56 = vsel %vm587_vm13, 1, %v2576_v2 }
 0x128   :  { %590 = vperm.xlu1 %2360, %v588_v56  }
 0x129   :  { %v2362_v57 = vpop.eup %2361 }
 0x12b   :  { %v2364_v61 = vpop.eup %2363 }
 0x12c   :  { %v2366_v62 = vpop.eup %2365  ;;  %v192_v63 = vrot.slane %v2364_v61, 7 }
 0x12d   :  { %v2368_v3 = vpop.eup %2367  ;;  %v195_v4 = vrot.slane %v2366_v62, 6 }
 0x12e   :  { %v2370_v5 = vpop.eup %2369  ;;  %v194_v10 = vsel %vm193_vm5, %v192_v63, %v2362_v57  ;;  %v198_v13 = vrot.slane %v2368_v3, 5  ;;  %v789_v57 = vsel %vm788_vm14, 1, %v2576_v2 }
 0x12f   :  { %v2372_v14 = vpop.eup %2371  ;;  %v197_v15 = vsel %vm196_vm6, %v195_v4, %v194_v10  ;;  %v201_v16 = vrot.slane %v2370_v5, 4  ;;  %791 = vperm.xlu1 %2360, %v789_v57  }
 0x130   :  { %v2374_v18 = vpop.eup %2373  ;;  %v200_v19 = vsel %vm199_vm7, %v198_v13, %v197_v15  ;;  %v204_v20 = vrot.slane %v2372_v14, 3 }
 0x131   :  { %v2376_v22 = vpop.eup %2375  ;;  %v203_v24 = vsel %vm202_vm8, %v201_v16, %v200_v19  ;;  %v207_v26 = vrot.slane %v2374_v18, 2 }
 0x132   :  { %v206_v29 = vsel %vm205_vm9, %v204_v20, %v203_v24  ;;  %v210_v30 = vrot.slane %v2376_v22, 1 }
 0x133   :  { %v209_v34 = vsel %vm208_vm10, %v207_v26, %v206_v29  ;;  %1193 = vperm.xlu1 %2360, %v1191_v58  }
 0x134   :  { %v212_v37 = vsel %vm211_vm11, %v210_v30, %v209_v34 }
 0x135   :  { %v2750_v38 = vsel %vm183_vm12, %v212_v37, 0.0  ;;  %1945 = vmatmul.mubr.msk.f32.vlgmr.msra.gmra.mrb[0].mxu1 %vm183_vm12, %v212_v37 }
 0x136   :  { %v217_v39 = vcombine.high %v2750_v38, %v2750_v38  ;;  %v224_v40 = vrot.slane %v2750_v38, %v2745_v27  ;;  %2231 = vmatpush3.bf16.msra.mxu1 %v2637_v6  ;;  %2014 = vmatprep.mubr.msk.f32.mxu1 %vm2574_vm0, %v2575_v1 }
 0x137   :  { %2232 = vmatprep.subr.bf16.mxu1 %v2573_v0  ;;  %1595 = vperm.xlu1 %2360, %v1593_v59  }
 0x138   :  { %v231_v41 = vrot.slane %v217_v39, %v2745_v27  ;;  %v232_v44 = vcombine.high %v224_v40, %v224_v40  ;;  %v240_v45 = vrot.slane %v224_v40, %v2745_v27  ;;  %1708 = vst.sshfl [vmem:[#allocation8] sm:$0x1 pattern:$0x73625140] %v224_v40 }
 0x13a   :  { %v233_v46 = vcombine.high %v231_v41, %v231_v41  ;;  %v247_v47 = vrot.slane %v231_v41, %v2745_v27  ;;  %v254_v49 = vrot.slane %v232_v44, %v2745_v27  ;;  %v262_v50 = vcombine.high %v240_v45, %v240_v45  ;;  %1709 = vst.sshfl [vmem:[#allocation8 + $0x8] sm:$0x1 pattern:$0x73625140] %v232_v44 }
 0x13b   :  { %1710 = vst.sshfl [vmem:[#allocation8 + $0x20] sm:$0x1 pattern:$0x73625140] %v231_v41  ;;  %2234 = vmatpush3.bf16.msra.mxu1 %v2640_v8 }
 0x13c   :  { %2235 = vmatprep.subr.bf16.mxu1 %v2573_v0  ;;  %v261_v51 = vrot.slane %v233_v46, %v2745_v27  ;;  %v263_v53 = vcombine.high %v247_v47, %v247_v47  ;;  %v264_v54 = vcombine.high %v254_v49, %v254_v49  ;;  %276 = vst [vmem:[#allocation8 + $0x10] sm:$0x1] %v262_v50  ;;  %1711 = vst.sshfl [vmem:[#allocation8 + $0x28] sm:$0x1 pattern:$0x73625140] %v233_v46 }
 0x13e   :  { %v265_v55 = vcombine.high %v261_v51, %v261_v51  ;;  %277 = vst [vmem:[#allocation8 + $0x18] sm:$0x1] %v264_v54  ;;  %280 = vst [vmem:[#allocation8 + $0x30] sm:$0x1] %v263_v53  ;;  %v390_v53 = vpop.permute.xlu0 %389 }
 0x13f   :  { %2237 = vmatpush3.bf16.msra.mxu1 %v2653_v12  ;;  %vm391_vm2 = vcmp.eq.s32.totalorder %v390_v53, 1 }
 0x140   :  { %2238 = vmatprep.subr.bf16.mxu1 %v2573_v0  ;;  %281 = vst [vmem:[#allocation8 + $0x38] sm:$0x1] %v265_v55 }
 0x143   :  { %2240 = vmatpush3.bf16.msra.mxu1 %v2662_v17 }
 0x144   :  { %2241 = vmatprep.subr.bf16.mxu1 %v2573_v0 }
 0x147   :  { %2243 = vmatpush3.bf16.msra.mxu1 %v2670_v21 }
 0x148   :  { %2244 = vmatprep.subr.bf16.mxu1 %v2573_v0 }
 0x14b   :  { %2246 = vmatpush3.bf16.msra.mxu1 %v2677_v25 }
 0x14c   :  { %2247 = vmatprep.subr.bf16.mxu1 %v2573_v0 }
 0x14f   :  { %2249 = vmatpush3.bf16.msra.mxu1 %v2683_v28 }
 0x150   :  { %2250 = vmatprep.subr.bf16.mxu1 %v2573_v0 }
 0x153   :  { %2252 = vmatpush3.bf16.msra.mxu1 %v2689_v31 }
 0x154   :  { %2277 = vmatprep.subr.bf16.mxu1 %v2573_v0 }
 0x208   :  { %v348_v60 = vpop.f32.mrb[0].mxu1 }
 0x209   :  { %v353_v61 = vrot.slane %v348_v60, 7  ;;  %v354_v62 = vrot.slane %v348_v60, 1  ;;  %v355_v63 = vrot.slane %v348_v60, 2  ;;  %v356_v3 = vrot.slane %v348_v60, 3  ;;  %v1946_v4 = vpop.f32.mrb[1].mxu1 }
 0x20a   :  { %v357_v5 = vrot.slane %v348_v60, 4  ;;  %v369_v7 = vadd.f32 %v348_v60, %v2719_v33  ;;  %v358_v9 = vrot.slane %v348_v60, 5  ;;  %v359_v14 = vrot.slane %v348_v60, 6 }
 0x20b   :  { %v368_v10 = vadd.f32 %v353_v61, %v2717_v32  ;;  %v370_v13 = vadd.f32 %v354_v62, %v2721_v35  ;;  %v371_v11 = vadd.f32 %v355_v63, %v2723_v36  ;;  %v372_v2 = vadd.f32 %v356_v3, %v2726_v42 }
 0x20c   :  { %2377 = vtanh.f32 %v369_v7  ;;  %v373_v15 = vadd.f32 %v357_v5, %v2728_v43  ;;  %v374_v16 = vadd.f32 %v358_v9, %v2731_v48  ;;  %v375_v18 = vadd.f32 %v359_v14, %v2735_v52 }
 0x20d   :  { %2379 = vtanh.f32 %v368_v10 }
 0x20e   :  { %2381 = vtanh.f32 %v370_v13 }
 0x20f   :  { %2383 = vtanh.f32 %v371_v11 }
 0x210   :  { %2385 = vtanh.f32 %v372_v2 }
 0x211   :  { %2387 = vtanh.f32 %v373_v15 }
 0x212   :  { %2389 = vtanh.f32 %v374_v16 }
 0x213   :  { %2391 = vtanh.f32 %v375_v18 }
 0x216   :  { %v2378_v19 = vpop.eup %2377 }
 0x217   :  { %v2380_v20 = vpop.eup %2379 }
 0x218   :  { %v2382_v22 = vpop.eup %2381  ;;  %v400_v23 = vrot.slane %v2380_v20, 1 }
 0x219   :  { %v2384_v24 = vpop.eup %2383  ;;  %v402_v26 = vrot.slane %v2382_v22, 7 }
 0x21a   :  { %v2386_v29 = vpop.eup %2385  ;;  %v401_v30 = vsel %vm193_vm5, %v2378_v19, %v400_v23  ;;  %v404_v34 = vrot.slane %v2384_v24, 6 }
 0x21b   :  { %v2388_v37 = vpop.eup %2387  ;;  %v403_v39 = vsel %vm196_vm6, %v402_v26, %v401_v30  ;;  %v406_v40 = vrot.slane %v2386_v29, 5 }
 0x21c   :  { %v2390_v41 = vpop.eup %2389  ;;  %v405_v44 = vsel %vm199_vm7, %v404_v34, %v403_v39  ;;  %v408_v45 = vrot.slane %v2388_v37, 4 }
 0x21d   :  { %v2392_v46 = vpop.eup %2391  ;;  %v407_v47 = vsel %vm202_vm8, %v406_v40, %v405_v44  ;;  %v410_v49 = vrot.slane %v2390_v41, 3 }
 0x21e   :  { %v409_v50 = vsel %vm205_vm9, %v408_v45, %v407_v47  ;;  %v412_v51 = vrot.slane %v2392_v46, 2 }
 0x21f   :  { %v411_v54 = vsel %vm208_vm10, %v410_v49, %v409_v50 }
 0x220   :  { %v413_v55 = vsel %vm211_vm11, %v412_v51, %v411_v54 }
 0x221   :  { %v2803_v56 = vsel %vm391_vm2, %v413_v55, %v2750_v38  ;;  %v416_v57 = vsel %vm391_vm2, %v413_v55, 0.0 }
 0x222   :  { %v418_v58 = vcombine.high %v416_v57, %v416_v57  ;;  %v425_v59 = vrot.slane %v416_v57, %v2745_v27  ;;  %1980 = vmatmul.mubr.f32.vlgmr.msra.gmra.mrb[2].mxu0 %v2803_v56 }
 0x223   :  { %2255 = vmatpush3.bf16.msra.mxu0 %v2637_v6  ;;  %2049 = vmatprep.mubr.msk.f32.mxu0 %vm2574_vm0, %v2575_v1 }
 0x224   :  { %v432_v60 = vrot.slane %v418_v58, %v2745_v27  ;;  %v433_v61 = vcombine.high %v425_v59, %v425_v59  ;;  %v441_v62 = vrot.slane %v425_v59, %v2745_v27  ;;  %1712 = vst.sshfl [vmem:[#allocation8 + $0x1] sm:$0x1 pattern:$0x73625140] %v425_v59  ;;  %2256 = vmatprep.subr.bf16.mxu0 %v2573_v0 }
 0x226   :  { %v434_v38 = vcombine.high %v432_v60, %v432_v60  ;;  %v448_v63 = vrot.slane %v432_v60, %v2745_v27  ;;  %v455_v3 = vrot.slane %v433_v61, %v2745_v27  ;;  %v463_v4 = vcombine.high %v441_v62, %v441_v62  ;;  %1713 = vst.sshfl [vmem:[#allocation8 + $0x9] sm:$0x1 pattern:$0x73625140] %v433_v61 }
 0x227   :  { %1714 = vst.sshfl [vmem:[#allocation8 + $0x21] sm:$0x1 pattern:$0x73625140] %v432_v60  ;;  %2258 = vmatpush3.bf16.msra.mxu0 %v2640_v8  ;;  %v591_v60 = vpop.permute.xlu1 %590 }
 0x228   :  { %v462_v5 = vrot.slane %v434_v38, %v2745_v27  ;;  %v464_v7 = vcombine.high %v448_v63, %v448_v63  ;;  %v465_v9 = vcombine.high %v455_v3, %v455_v3  ;;  %477 = vst [vmem:[#allocation8 + $0x11] sm:$0x1] %v463_v4  ;;  %1715 = vst.sshfl [vmem:[#allocation8 + $0x29] sm:$0x1 pattern:$0x73625140] %v434_v38  ;;  %2259 = vmatprep.subr.bf16.mxu0 %v2573_v0 }
 0x229   :  { %vm592_vm3 = vcmp.eq.s32.totalorder %v591_v60, 1 }
 0x22a   :  { %v466_v10 = vcombine.high %v462_v5, %v462_v5  ;;  %478 = vst [vmem:[#allocation8 + $0x19] sm:$0x1] %v465_v9  ;;  %481 = vst [vmem:[#allocation8 + $0x31] sm:$0x1] %v464_v7 }
 0x22b   :  { %2261 = vmatpush3.bf16.msra.mxu0 %v2653_v12 }
 0x22c   :  { %482 = vst [vmem:[#allocation8 + $0x39] sm:$0x1] %v466_v10  ;;  %2262 = vmatprep.subr.bf16.mxu0 %v2573_v0 }
 0x22f   :  { %2264 = vmatpush3.bf16.msra.mxu0 %v2662_v17 }
 0x230   :  { %2265 = vmatprep.subr.bf16.mxu0 %v2573_v0 }
 0x233   :  { %2267 = vmatpush3.bf16.msra.mxu0 %v2670_v21 }
 0x234   :  { %2268 = vmatprep.subr.bf16.mxu0 %v2573_v0 }
 0x237   :  { %2270 = vmatpush3.bf16.msra.mxu0 %v2677_v25 }
 0x238   :  { %2271 = vmatprep.subr.bf16.mxu0 %v2573_v0 }
 0x23b   :  { %2273 = vmatpush3.bf16.msra.mxu0 %v2683_v28 }
 0x23c   :  { %2274 = vmatprep.subr.bf16.mxu0 %v2573_v0 }
 0x23f   :  { %2276 = vmatpush3.bf16.msra.mxu0 %v2689_v31 }
 0x240   :  { %2301 = vmatprep.subr.bf16.mxu0 %v2573_v0 }
 0x2f5   :  { %v549_v13 = vpop.f32.mrb[2].mxu0 }
 0x2f6   :  { %v554_v11 = vrot.slane %v549_v13, 6  ;;  %v555_v14 = vrot.slane %v549_v13, 7  ;;  %v556_v2 = vrot.slane %v549_v13, 1  ;;  %v571_v15 = vadd.f32 %v549_v13, %v2721_v35  ;;  %v1981_v16 = vpop.f32.mrb[3].mxu0 }
 0x2f7   :  { %v557_v18 = vrot.slane %v549_v13, 2  ;;  %v558_v19 = vrot.slane %v549_v13, 3  ;;  %v559_v20 = vrot.slane %v549_v13, 4  ;;  %v560_v24 = vrot.slane %v549_v13, 5 }
 0x2f8   :  { %v569_v22 = vadd.f32 %v554_v11, %v2717_v32  ;;  %v570_v23 = vadd.f32 %v555_v14, %v2719_v33  ;;  %v572_v26 = vadd.f32 %v556_v2, %v2723_v36  ;;  %2393 = vtanh.f32 %v571_v15 }
 0x2f9   :  { %v573_v29 = vadd.f32 %v557_v18, %v2726_v42  ;;  %v574_v30 = vadd.f32 %v558_v19, %v2728_v43  ;;  %v575_v34 = vadd.f32 %v559_v20, %v2731_v48  ;;  %v576_v37 = vadd.f32 %v560_v24, %v2735_v52 }
 0x2fa   :  { %2395 = vtanh.f32 %v569_v22 }
 0x2fb   :  { %2397 = vtanh.f32 %v570_v23 }
 0x2fc   :  { %2399 = vtanh.f32 %v572_v26 }
 0x2fd   :  { %2401 = vtanh.f32 %v573_v29 }
 0x2fe   :  { %2403 = vtanh.f32 %v574_v30 }
 0x2ff   :  { %2405 = vtanh.f32 %v575_v34 }
 0x300   :  { %2407 = vtanh.f32 %v576_v37 }
 0x302   :  { %v2394_v39 = vpop.eup %2393 }
 0x304   :  { %v2396_v40 = vpop.eup %2395 }
 0x305   :  { %v2398_v41 = vpop.eup %2397  ;;  %v601_v44 = vrot.slane %v2396_v40, 2 }
 0x306   :  { %v2400_v45 = vpop.eup %2399  ;;  %v602_v46 = vrot.slane %v2398_v41, 1 }
 0x307   :  { %v2402_v47 = vpop.eup %2401  ;;  %v605_v51 = vrot.slane %v2400_v45, 7 }
 0x308   :  { %v2404_v49 = vpop.eup %2403  ;;  %v603_v50 = vsel %vm193_vm5, %v602_v46, %v601_v44  ;;  %v607_v55 = vrot.slane %v2402_v47, 6 }
 0x309   :  { %v2406_v53 = vpop.eup %2405  ;;  %v604_v54 = vsel %vm196_vm6, %v2394_v39, %v603_v50  ;;  %v609_v59 = vrot.slane %v2404_v49, 5 }
 0x30a   :  { %v2408_v57 = vpop.eup %2407  ;;  %v606_v58 = vsel %vm199_vm7, %v605_v51, %v604_v54  ;;  %v611_v62 = vrot.slane %v2406_v53, 4 }
 0x30b   :  { %v608_v61 = vsel %vm202_vm8, %v607_v55, %v606_v58  ;;  %v613_v63 = vrot.slane %v2408_v57, 3 }
 0x30c   :  { %v610_v38 = vsel %vm205_vm9, %v609_v59, %v608_v61 }
 0x30d   :  { %v612_v3 = vsel %vm208_vm10, %v611_v62, %v610_v38 }
 0x30e   :  { %v614_v4 = vsel %vm211_vm11, %v613_v63, %v612_v3 }
 0x30f   :  { %v2846_v5 = vsel %vm592_vm3, %v614_v4, %v2803_v56  ;;  %v617_v7 = vsel %vm592_vm3, %v614_v4, 0.0 }
 0x310   :  { %v619_v9 = vcombine.high %v617_v7, %v617_v7  ;;  %v626_v10 = vrot.slane %v617_v7, %v2745_v27  ;;  %2015 = vmatmul.mubr.f32.vlgmr.msra.gmra.mrb[2].mxu1 %v2846_v5 }
 0x311   :  { %2279 = vmatpush3.bf16.msra.mxu1 %v2637_v6  ;;  %2084 = vmatprep.mubr.msk.f32.mxu1 %vm2574_vm0, %v2575_v1 }
 0x312   :  { %v633_v13 = vrot.slane %v619_v9, %v2745_v27  ;;  %v634_v11 = vcombine.high %v626_v10, %v626_v10  ;;  %v642_v14 = vrot.slane %v626_v10, %v2745_v27  ;;  %1716 = vst.sshfl [vmem:[#allocation8 + $0x2] sm:$0x1 pattern:$0x73625140] %v626_v10  ;;  %2280 = vmatprep.subr.bf16.mxu1 %v2573_v0 }
 0x314   :  { %v635_v56 = vcombine.high %v633_v13, %v633_v13  ;;  %v649_v2 = vrot.slane %v633_v13, %v2745_v27  ;;  %v656_v15 = vrot.slane %v634_v11, %v2745_v27  ;;  %v664_v16 = vcombine.high %v642_v14, %v642_v14  ;;  %1717 = vst.sshfl [vmem:[#allocation8 + $0xa] sm:$0x1 pattern:$0x73625140] %v634_v11 }
 0x315   :  { %1718 = vst.sshfl [vmem:[#allocation8 + $0x22] sm:$0x1 pattern:$0x73625140] %v633_v13  ;;  %2282 = vmatpush3.bf16.msra.mxu1 %v2640_v8 }
 0x316   :  { %v663_v18 = vrot.slane %v635_v56, %v2745_v27  ;;  %v665_v19 = vcombine.high %v649_v2, %v649_v2  ;;  %v666_v20 = vcombine.high %v656_v15, %v656_v15  ;;  %678 = vst [vmem:[#allocation8 + $0x12] sm:$0x1] %v664_v16  ;;  %1719 = vst.sshfl [vmem:[#allocation8 + $0x2a] sm:$0x1 pattern:$0x73625140] %v635_v56  ;;  %2283 = vmatprep.subr.bf16.mxu1 %v2573_v0  ;;  %v792_v2 = vpop.permute.xlu1 %791 }
 0x317   :  { %vm793_vm4 = vcmp.eq.s32.totalorder %v792_v2, 1 }
 0x318   :  { %v667_v22 = vcombine.high %v663_v18, %v663_v18  ;;  %679 = vst [vmem:[#allocation8 + $0x1a] sm:$0x1] %v666_v20  ;;  %682 = vst [vmem:[#allocation8 + $0x32] sm:$0x1] %v665_v19 }
 0x319   :  { %2285 = vmatpush3.bf16.msra.mxu1 %v2653_v12 }
 0x31a   :  { %683 = vst [vmem:[#allocation8 + $0x3a] sm:$0x1] %v667_v22  ;;  %2286 = vmatprep.subr.bf16.mxu1 %v2573_v0 }
 0x31d   :  { %2288 = vmatpush3.bf16.msra.mxu1 %v2662_v17 }
 0x31e   :  { %2289 = vmatprep.subr.bf16.mxu1 %v2573_v0 }
 0x321   :  { %2291 = vmatpush3.bf16.msra.mxu1 %v2670_v21 }
 0x322   :  { %2292 = vmatprep.subr.bf16.mxu1 %v2573_v0 }
 0x325   :  { %2294 = vmatpush3.bf16.msra.mxu1 %v2677_v25 }
 0x326   :  { %2295 = vmatprep.subr.bf16.mxu1 %v2573_v0 }
 0x329   :  { %2297 = vmatpush3.bf16.msra.mxu1 %v2683_v28 }
 0x32a   :  { %2298 = vmatprep.subr.bf16.mxu1 %v2573_v0 }
 0x32d   :  { %2300 = vmatpush3.bf16.msra.mxu1 %v2689_v31 }
 0x32e   :  { %2325 = vmatprep.subr.bf16.mxu1 %v2573_v0 }
 0x3e3   :  { %v750_v23 = vpop.f32.mrb[2].mxu1 }
 0x3e4   :  { %v755_v24 = vrot.slane %v750_v23, 5  ;;  %v756_v26 = vrot.slane %v750_v23, 6  ;;  %v757_v29 = vrot.slane %v750_v23, 7  ;;  %v758_v30 = vrot.slane %v750_v23, 1  ;;  %v2016_v34 = vpop.f32.mrb[3].mxu1 }
 0x3e5   :  { %v759_v37 = vrot.slane %v750_v23, 2  ;;  %v773_v39 = vadd.f32 %v750_v23, %v2723_v36  ;;  %v760_v40 = vrot.slane %v750_v23, 3  ;;  %v761_v46 = vrot.slane %v750_v23, 4 }
 0x3e6   :  { %v770_v41 = vadd.f32 %v755_v24, %v2717_v32  ;;  %v771_v44 = vadd.f32 %v756_v26, %v2719_v33  ;;  %v772_v45 = vadd.f32 %v757_v29, %v2721_v35  ;;  %v774_v47 = vadd.f32 %v758_v30, %v2726_v42 }
 0x3e7   :  { %2409 = vtanh.f32 %v773_v39  ;;  %v775_v49 = vadd.f32 %v759_v37, %v2728_v43  ;;  %v776_v50 = vadd.f32 %v760_v40, %v2731_v48  ;;  %v777_v51 = vadd.f32 %v761_v46, %v2735_v52 }
 0x3e8   :  { %2411 = vtanh.f32 %v770_v41 }
 0x3e9   :  { %2413 = vtanh.f32 %v771_v44 }
 0x3ea   :  { %2415 = vtanh.f32 %v772_v45 }
 0x3eb   :  { %2417 = vtanh.f32 %v774_v47 }
 0x3ec   :  { %2419 = vtanh.f32 %v775_v49 }
 0x3ed   :  { %2421 = vtanh.f32 %v776_v50 }
 0x3ee   :  { %2423 = vtanh.f32 %v777_v51 }
 0x3f1   :  { %v2410_v53 = vpop.eup %2409 }
 0x3f2   :  { %v2412_v54 = vpop.eup %2411 }
 0x3f3   :  { %v2414_v55 = vpop.eup %2413  ;;  %v802_v57 = vrot.slane %v2412_v54, 3 }
 0x3f4   :  { %v2416_v58 = vpop.eup %2415  ;;  %v803_v59 = vrot.slane %v2414_v55, 2 }
 0x3f5   :  { %v2418_v60 = vpop.eup %2417  ;;  %v805_v61 = vrot.slane %v2416_v58, 1 }
 0x3f6   :  { %v2420_v62 = vpop.eup %2419  ;;  %v804_v38 = vsel %vm193_vm5, %v803_v59, %v802_v57  ;;  %v808_v4 = vrot.slane %v2418_v60, 7 }
 0x3f7   :  { %v2422_v63 = vpop.eup %2421  ;;  %v806_v3 = vsel %vm196_vm6, %v805_v61, %v804_v38  ;;  %v810_v10 = vrot.slane %v2420_v62, 6 }
 0x3f8   :  { %v2424_v7 = vpop.eup %2423  ;;  %v807_v9 = vsel %vm199_vm7, %v2410_v53, %v806_v3  ;;  %v812_v11 = vrot.slane %v2422_v63, 5 }
 0x3f9   :  { %v809_v13 = vsel %vm202_vm8, %v808_v4, %v807_v9  ;;  %v814_v56 = vrot.slane %v2424_v7, 4 }
 0x3fa   :  { %v811_v14 = vsel %vm205_vm9, %v810_v10, %v809_v13 }
 0x3fb   :  { %v813_v15 = vsel %vm208_vm10, %v812_v11, %v811_v14 }
 0x3fc   :  { %v815_v16 = vsel %vm211_vm11, %v814_v56, %v813_v15 }
 0x3fd   :  { %v2889_v18 = vsel %vm793_vm4, %v815_v16, %v2846_v5  ;;  %v818_v19 = vsel %vm793_vm4, %v815_v16, 0.0 }
 0x3fe   :  { %v820_v20 = vcombine.high %v818_v19, %v818_v19  ;;  %v827_v22 = vrot.slane %v818_v19, %v2745_v27  ;;  %2050 = vmatmul.mubr.f32.vlgmr.msra.gmra.mrb[4].mxu0 %v2889_v18 }
 0x3ff   :  { %2303 = vmatpush3.bf16.msra.mxu0 %v2637_v6  ;;  %2119 = vmatprep.mubr.msk.f32.mxu0 %vm2574_vm0, %v2575_v1 }
 0x400   :  { %v834_v23 = vrot.slane %v820_v20, %v2745_v27  ;;  %v835_v24 = vcombine.high %v827_v22, %v827_v22  ;;  %v843_v26 = vrot.slane %v827_v22, %v2745_v27  ;;  %1720 = vst.sshfl [vmem:[#allocation8 + $0x3] sm:$0x1 pattern:$0x73625140] %v827_v22  ;;  %2304 = vmatprep.subr.bf16.mxu0 %v2573_v0 }
 0x402   :  { %v836_v5 = vcombine.high %v834_v23, %v834_v23  ;;  %v850_v29 = vrot.slane %v834_v23, %v2745_v27  ;;  %v857_v30 = vrot.slane %v835_v24, %v2745_v27  ;;  %v865_v34 = vcombine.high %v843_v26, %v843_v26  ;;  %1721 = vst.sshfl [vmem:[#allocation8 + $0xb] sm:$0x1 pattern:$0x73625140] %v835_v24 }
 0x403   :  { %1722 = vst.sshfl [vmem:[#allocation8 + $0x23] sm:$0x1 pattern:$0x73625140] %v834_v23  ;;  %2306 = vmatpush3.bf16.msra.mxu0 %v2640_v8 }
 0x404   :  { %v864_v37 = vrot.slane %v836_v5, %v2745_v27  ;;  %v866_v39 = vcombine.high %v850_v29, %v850_v29  ;;  %v867_v40 = vcombine.high %v857_v30, %v857_v30  ;;  %879 = vst [vmem:[#allocation8 + $0x13] sm:$0x1] %v865_v34  ;;  %1723 = vst.sshfl [vmem:[#allocation8 + $0x2b] sm:$0x1 pattern:$0x73625140] %v836_v5  ;;  %2307 = vmatprep.subr.bf16.mxu0 %v2573_v0  ;;  %v993_v29 = vpop.permute.xlu0 %992 }
 0x405   :  { %vm994_vm12 = vcmp.eq.s32.totalorder %v993_v29, 1 }
 0x406   :  { %v868_v41 = vcombine.high %v864_v37, %v864_v37  ;;  %880 = vst [vmem:[#allocation8 + $0x1b] sm:$0x1] %v867_v40  ;;  %883 = vst [vmem:[#allocation8 + $0x33] sm:$0x1] %v866_v39 }
 0x407   :  { %2309 = vmatpush3.bf16.msra.mxu0 %v2653_v12 }
 0x408   :  { %884 = vst [vmem:[#allocation8 + $0x3b] sm:$0x1] %v868_v41  ;;  %2310 = vmatprep.subr.bf16.mxu0 %v2573_v0 }
 0x40b   :  { %2312 = vmatpush3.bf16.msra.mxu0 %v2662_v17 }
 0x40c   :  { %2313 = vmatprep.subr.bf16.mxu0 %v2573_v0 }
 0x40f   :  { %2315 = vmatpush3.bf16.msra.mxu0 %v2670_v21 }
 0x410   :  { %2316 = vmatprep.subr.bf16.mxu0 %v2573_v0 }
 0x413   :  { %2318 = vmatpush3.bf16.msra.mxu0 %v2677_v25 }
 0x414   :  { %2319 = vmatprep.subr.bf16.mxu0 %v2573_v0 }
 0x417   :  { %2321 = vmatpush3.bf16.msra.mxu0 %v2683_v28 }
 0x418   :  { %2322 = vmatprep.subr.bf16.mxu0 %v2573_v0 }
 0x41b   :  { %2324 = vmatpush3.bf16.msra.mxu0 %v2689_v31 }
 0x4d1   :  { %v951_v44 = vpop.f32.mrb[4].mxu0 }
 0x4d2   :  { %v956_v45 = vrot.slane %v951_v44, 4  ;;  %v957_v46 = vrot.slane %v951_v44, 5  ;;  %v958_v47 = vrot.slane %v951_v44, 6  ;;  %v959_v49 = vrot.slane %v951_v44, 7  ;;  %v2051_v50 = vpop.f32.mrb[5].mxu0 }
 0x4d3   :  { %v960_v51 = vrot.slane %v951_v44, 1  ;;  %v975_v53 = vadd.f32 %v951_v44, %v2726_v42  ;;  %v961_v54 = vrot.slane %v951_v44, 2  ;;  %v962_v59 = vrot.slane %v951_v44, 3 }
 0x4d4   :  { %v971_v55 = vadd.f32 %v956_v45, %v2717_v32  ;;  %v972_v57 = vadd.f32 %v957_v46, %v2719_v33  ;;  %v973_v58 = vadd.f32 %v958_v47, %v2721_v35  ;;  %v974_v60 = vadd.f32 %v959_v49, %v2723_v36 }
 0x4d5   :  { %2425 = vtanh.f32 %v975_v53  ;;  %v976_v61 = vadd.f32 %v960_v51, %v2728_v43  ;;  %v977_v62 = vadd.f32 %v961_v54, %v2731_v48  ;;  %v978_v38 = vadd.f32 %v962_v59, %v2735_v52 }
 0x4d6   :  { %2427 = vtanh.f32 %v971_v55 }
 0x4d7   :  { %2429 = vtanh.f32 %v972_v57 }
 0x4d8   :  { %2431 = vtanh.f32 %v973_v58 }
 0x4d9   :  { %2433 = vtanh.f32 %v974_v60 }
 0x4da   :  { %2435 = vtanh.f32 %v976_v61 }
 0x4db   :  { %2437 = vtanh.f32 %v977_v62 }
 0x4dc   :  { %2439 = vtanh.f32 %v978_v38 }
 0x4df   :  { %v2426_v63 = vpop.eup %2425 }
 0x4e0   :  { %v2428_v3 = vpop.eup %2427 }
 0x4e1   :  { %v2430_v4 = vpop.eup %2429  ;;  %v1003_v7 = vrot.slane %v2428_v3, 4 }
 0x4e2   :  { %v2432_v9 = vpop.eup %2431  ;;  %v1004_v10 = vrot.slane %v2430_v4, 3 }
 0x4e3   :  { %v2434_v13 = vpop.eup %2433  ;;  %v1006_v11 = vrot.slane %v2432_v9, 2 }
 0x4e4   :  { %v2436_v14 = vpop.eup %2435  ;;  %v1005_v56 = vsel %vm193_vm5, %v1004_v10, %v1003_v7  ;;  %v1008_v2 = vrot.slane %v2434_v13, 1 }
 0x4e5   :  { %v2438_v15 = vpop.eup %2437  ;;  %v1007_v16 = vsel %vm196_vm6, %v1006_v11, %v1005_v56  ;;  %v1011_v22 = vrot.slane %v2436_v14, 7 }
 0x4e6   :  { %v2440_v19 = vpop.eup %2439  ;;  %v1009_v20 = vsel %vm199_vm7, %v1008_v2, %v1007_v16  ;;  %v1013_v24 = vrot.slane %v2438_v15, 6  ;;  %v1194_v16 = vpop.permute.xlu1 %1193 }
 0x4e7   :  { %v1010_v23 = vsel %vm202_vm8, %v2426_v63, %v1009_v20  ;;  %v1015_v5 = vrot.slane %v2440_v19, 5 }
 0x4e8   :  { %v1012_v26 = vsel %vm205_vm9, %v1011_v22, %v1010_v23 }
 0x4e9   :  { %v1014_v30 = vsel %vm208_vm10, %v1013_v24, %v1012_v26 }
 0x4ea   :  { %v1016_v34 = vsel %vm211_vm11, %v1015_v5, %v1014_v30 }
 0x4eb   :  { %v2931_v37 = vsel %vm994_vm12, %v1016_v34, %v2889_v18  ;;  %v1019_v39 = vsel %vm994_vm12, %v1016_v34, 0.0 }
 0x4ec   :  { %v1021_v40 = vcombine.high %v1019_v39, %v1019_v39  ;;  %v1028_v41 = vrot.slane %v1019_v39, %v2745_v27  ;;  %2085 = vmatmul.mubr.f32.vlgmr.msra.gmra.mrb[4].mxu1 %v2931_v37 }
 0x4ed   :  { %2327 = vmatpush3.bf16.msra.mxu1 %v2637_v6  ;;  %2154 = vmatprep.mubr.msk.f32.mxu1 %vm2574_vm0, %v2575_v1  ;;  %vm1195_vm0 = vcmp.eq.s32.totalorder %v1194_v16, 1 }
 0x4ee   :  { %v1035_v44 = vrot.slane %v1021_v40, %v2745_v27  ;;  %v1036_v45 = vcombine.high %v1028_v41, %v1028_v41  ;;  %v1044_v46 = vrot.slane %v1028_v41, %v2745_v27  ;;  %1724 = vst.sshfl [vmem:[#allocation8 + $0x4] sm:$0x1 pattern:$0x73625140] %v1028_v41  ;;  %2328 = vmatprep.subr.bf16.mxu1 %v2573_v0 }
 0x4f0   :  { %v1037_v18 = vcombine.high %v1035_v44, %v1035_v44  ;;  %v1051_v47 = vrot.slane %v1035_v44, %v2745_v27  ;;  %v1058_v49 = vrot.slane %v1036_v45, %v2745_v27  ;;  %v1066_v50 = vcombine.high %v1044_v46, %v1044_v46  ;;  %1725 = vst.sshfl [vmem:[#allocation8 + $0xc] sm:$0x1 pattern:$0x73625140] %v1036_v45 }
 0x4f1   :  { %1726 = vst.sshfl [vmem:[#allocation8 + $0x24] sm:$0x1 pattern:$0x73625140] %v1035_v44  ;;  %2330 = vmatpush3.bf16.msra.mxu1 %v2640_v8 }
 0x4f2   :  { %v1065_v1 = vrot.slane %v1037_v18, %v2745_v27  ;;  %v1067_v6 = vcombine.high %v1051_v47, %v1051_v47  ;;  %v1068_v51 = vcombine.high %v1058_v49, %v1058_v49  ;;  %1080 = vst [vmem:[#allocation8 + $0x14] sm:$0x1] %v1066_v50  ;;  %1727 = vst.sshfl [vmem:[#allocation8 + $0x2c] sm:$0x1 pattern:$0x73625140] %v1037_v18  ;;  %2331 = vmatprep.subr.bf16.mxu1 %v2573_v0 }
 0x4f4   :  { %v1069_v53 = vcombine.high %v1065_v1, %v1065_v1  ;;  %1081 = vst [vmem:[#allocation8 + $0x1c] sm:$0x1] %v1068_v51  ;;  %1084 = vst [vmem:[#allocation8 + $0x34] sm:$0x1] %v1067_v6 }
 0x4f5   :  { %2333 = vmatpush3.bf16.msra.mxu1 %v2653_v12 }
 0x4f6   :  { %1085 = vst [vmem:[#allocation8 + $0x3c] sm:$0x1] %v1069_v53  ;;  %2334 = vmatprep.subr.bf16.mxu1 %v2573_v0 }
 0x4f9   :  { %2336 = vmatpush3.bf16.msra.mxu1 %v2662_v17 }
 0x4fa   :  { %2337 = vmatprep.subr.bf16.mxu1 %v2573_v0 }
 0x4fd   :  { %2339 = vmatpush3.bf16.msra.mxu1 %v2670_v21 }
 0x4fe   :  { %2340 = vmatprep.subr.bf16.mxu1 %v2573_v0 }
 0x501   :  { %2342 = vmatpush3.bf16.msra.mxu1 %v2677_v25 }
 0x502   :  { %2343 = vmatprep.subr.bf16.mxu1 %v2573_v0 }
 0x505   :  { %2345 = vmatpush3.bf16.msra.mxu1 %v2683_v28 }
 0x506   :  { %2346 = vmatprep.subr.bf16.mxu1 %v2573_v0 }
 0x509   :  { %2348 = vmatpush3.bf16.msra.mxu1 %v2689_v31 }
 0x5bf   :  { %v1152_v8 = vpop.f32.mrb[4].mxu1 }
 0x5c0   :  { %v1157_v12 = vrot.slane %v1152_v8, 3  ;;  %v1158_v54 = vrot.slane %v1152_v8, 4  ;;  %v1159_v17 = vrot.slane %v1152_v8, 5  ;;  %v1160_v55 = vrot.slane %v1152_v8, 6  ;;  %v2086_v57 = vpop.f32.mrb[5].mxu1 }
 0x5c1   :  { %v1161_v58 = vrot.slane %v1152_v8, 7  ;;  %v1162_v21 = vrot.slane %v1152_v8, 1  ;;  %v1163_v61 = vrot.slane %v1152_v8, 2  ;;  %v1177_v38 = vadd.f32 %v1152_v8, %v2728_v43  ;;  %v2982_v8 = vld [vmem:[#allocation3] sm:$0xff] }
 0x5c2   :  { %v1172_v59 = vadd.f32 %v1157_v12, %v2717_v32  ;;  %v1173_v25 = vadd.f32 %v1158_v54, %v2719_v33  ;;  %v1174_v60 = vadd.f32 %v1159_v17, %v2721_v35  ;;  %v1175_v28 = vadd.f32 %v1160_v55, %v2723_v36  ;;  %v2985_v54 = vld [vmem:[#allocation3 + $0x8] sm:$0xff]  ;;  %v2988_v55 = vld [vmem:[#allocation3 + $0x10] sm:$0xff] }
 0x5c3   :  { %v1176_v0 = vadd.f32 %v1161_v58, %v2726_v42  ;;  %v1178_v31 = vadd.f32 %v1162_v21, %v2731_v48  ;;  %v1179_v62 = vadd.f32 %v1163_v61, %v2735_v52  ;;  %v2991_v21 = vld [vmem:[#allocation3 + $0x18] sm:$0xff]  ;;  %v2997_v61 = vld [vmem:[#allocation3 + $0x28] sm:$0xff] }
 0x5c4   :  { %2441 = vtanh.f32 %v1172_v59 }
 0x5c5   :  { %2443 = vtanh.f32 %v1173_v25  ;;  %v2994_v25 = vld [vmem:[#allocation3 + $0x20] sm:$0xff] }
 0x5c6   :  { %2445 = vtanh.f32 %v1174_v60 }
 0x5c7   :  { %2447 = vtanh.f32 %v1175_v28 }
 0x5c8   :  { %2449 = vtanh.f32 %v1176_v0  ;;  %v3000_v0 = vld [vmem:[#allocation3 + $0x38] sm:$0xff] }
 0x5c9   :  { %2451 = vtanh.f32 %v1178_v31 }
 0x5ca   :  { %2453 = vtanh.f32 %v1179_v62  ;;  %v3003_v62 = vld [vmem:[#allocation3 + $0x30] sm:$0xff] }
 0x5cb   :  { %2455 = vtanh.f32 %v1177_v38 }
 0x5ce   :  { %v2442_v32 = vpop.eup %2441 }
 0x5cf   :  { %v2444_v33 = vpop.eup %2443  ;;  %v1204_v35 = vrot.slane %v2442_v32, 5 }
 0x5d0   :  { %v2446_v36 = vpop.eup %2445  ;;  %v1205_v63 = vrot.slane %v2444_v33, 4 }
 0x5d1   :  { %v2448_v3 = vpop.eup %2447  ;;  %v1207_v42 = vrot.slane %v2446_v36, 3 }
 0x5d2   :  { %v2450_v4 = vpop.eup %2449  ;;  %v1206_v48 = vsel %vm193_vm5, %v1205_v63, %v1204_v35  ;;  %v1209_v7 = vrot.slane %v2448_v3, 2 }
 0x5d3   :  { %v2452_v9 = vpop.eup %2451  ;;  %v1208_v52 = vsel %vm196_vm6, %v1207_v42, %v1206_v48  ;;  %v1211_v43 = vrot.slane %v2450_v4, 1 }
 0x5d4   :  { %v2454_v10 = vpop.eup %2453  ;;  %v1210_v13 = vsel %vm199_vm7, %v1209_v7, %v1208_v52  ;;  %v1214_v56 = vrot.slane %v2452_v9, 7 }
 0x5d5   :  { %v2456_v11 = vpop.eup %2455  ;;  %v1212_v14 = vsel %vm202_vm8, %v1211_v43, %v1210_v13  ;;  %v1216_v15 = vrot.slane %v2454_v10, 6 }
 0x5d6   :  { %v1213_v2 = vsel %vm205_vm9, %v2456_v11, %v1212_v14  ;;  %v1395_v14 = vpop.permute.xlu0 %1394 }
 0x5d7   :  { %v1215_v19 = vsel %vm208_vm10, %v1214_v56, %v1213_v2  ;;  %vm1396_vm13 = vcmp.eq.s32.totalorder %v1395_v14, 1 }
 0x5d8   :  { %v1217_v20 = vsel %vm211_vm11, %v1216_v15, %v1215_v19 }
 0x5d9   :  { %v2973_v22 = vsel %vm1195_vm0, %v1217_v20, %v2931_v37  ;;  %v1220_v23 = vsel %vm1195_vm0, %v1217_v20, 0.0 }
 0x5da   :  { %v1222_v24 = vcombine.high %v1220_v23, %v1220_v23  ;;  %v1229_v26 = vrot.slane %v1220_v23, %v2745_v27  ;;  %2120 = vmatmul.mubr.f32.vlgmr.msra.gmra.mrb[6].mxu0 %v2973_v22 }
 0x5dc   :  { %v1236_v5 = vrot.slane %v1222_v24, %v2745_v27  ;;  %v1237_v29 = vcombine.high %v1229_v26, %v1229_v26  ;;  %v1245_v30 = vrot.slane %v1229_v26, %v2745_v27  ;;  %1728 = vst.sshfl [vmem:[#allocation8 + $0x5] sm:$0x1 pattern:$0x73625140] %v1229_v26 }
 0x5de   :  { %v1238_v34 = vcombine.high %v1236_v5, %v1236_v5  ;;  %v1252_v39 = vrot.slane %v1236_v5, %v2745_v27  ;;  %v1259_v40 = vrot.slane %v1237_v29, %v2745_v27  ;;  %v1267_v41 = vcombine.high %v1245_v30, %v1245_v30  ;;  %1729 = vst.sshfl [vmem:[#allocation8 + $0xd] sm:$0x1 pattern:$0x73625140] %v1237_v29 }
 0x5df   :  { %1730 = vst.sshfl [vmem:[#allocation8 + $0x25] sm:$0x1 pattern:$0x73625140] %v1236_v5 }
 0x5e0   :  { %v1266_v37 = vrot.slane %v1238_v34, %v2745_v27  ;;  %v1268_v44 = vcombine.high %v1252_v39, %v1252_v39  ;;  %v1269_v45 = vcombine.high %v1259_v40, %v1259_v40  ;;  %1281 = vst [vmem:[#allocation8 + $0x15] sm:$0x1] %v1267_v41  ;;  %1731 = vst.sshfl [vmem:[#allocation8 + $0x2d] sm:$0x1 pattern:$0x73625140] %v1238_v34 }
 0x5e2   :  { %v1270_v46 = vcombine.high %v1266_v37, %v1266_v37  ;;  %1282 = vst [vmem:[#allocation8 + $0x1d] sm:$0x1] %v1269_v45  ;;  %1285 = vst [vmem:[#allocation8 + $0x35] sm:$0x1] %v1268_v44 }
 0x5e4   :  { %1286 = vst [vmem:[#allocation8 + $0x3d] sm:$0x1] %v1270_v46 }
 0x6ad   :  { %v1353_v18 = vpop.f32.mrb[6].mxu0 }
 0x6ae   :  { %v1358_v47 = vrot.slane %v1353_v18, 2  ;;  %v1359_v49 = vrot.slane %v1353_v18, 3  ;;  %v1360_v50 = vrot.slane %v1353_v18, 4  ;;  %v1361_v1 = vrot.slane %v1353_v18, 5  ;;  %v2121_v6 = vpop.f32.mrb[7].mxu0 }
 0x6af   :  { %v1362_v51 = vrot.slane %v1353_v18, 6  ;;  %v1363_v53 = vrot.slane %v1353_v18, 7  ;;  %v1364_v58 = vrot.slane %v1353_v18, 1  ;;  %v1379_v38 = vadd.f32 %v3003_v62, %v1353_v18 }
 0x6b0   :  { %v1373_v12 = vadd.f32 %v2982_v8, %v1358_v47  ;;  %v1374_v17 = vadd.f32 %v2985_v54, %v1359_v49  ;;  %v1375_v57 = vadd.f32 %v2988_v55, %v1360_v50  ;;  %v1376_v59 = vadd.f32 %v2991_v21, %v1361_v1 }
 0x6b1   :  { %v1377_v60 = vadd.f32 %v2994_v25, %v1362_v51  ;;  %v1378_v28 = vadd.f32 %v2997_v61, %v1363_v53  ;;  %v1380_v31 = vadd.f32 %v3000_v0, %v1364_v58 }
 0x6b2   :  { %2457 = vtanh.f32 %v1373_v12 }
 0x6b3   :  { %2459 = vtanh.f32 %v1374_v17 }
 0x6b4   :  { %2461 = vtanh.f32 %v1375_v57 }
 0x6b5   :  { %2463 = vtanh.f32 %v1376_v59 }
 0x6b6   :  { %2465 = vtanh.f32 %v1377_v60 }
 0x6b7   :  { %2467 = vtanh.f32 %v1378_v28 }
 0x6b8   :  { %2469 = vtanh.f32 %v1380_v31 }
 0x6b9   :  { %2471 = vtanh.f32 %v1379_v38 }
 0x6bc   :  { %v2458_v32 = vpop.eup %2457 }
 0x6bd   :  { %v2460_v33 = vpop.eup %2459  ;;  %v1405_v35 = vrot.slane %v2458_v32, 6 }
 0x6be   :  { %v2462_v36 = vpop.eup %2461  ;;  %v1406_v63 = vrot.slane %v2460_v33, 5 }
 0x6bf   :  { %v2464_v3 = vpop.eup %2463  ;;  %v1408_v42 = vrot.slane %v2462_v36, 4 }
 0x6c0   :  { %v2466_v4 = vpop.eup %2465  ;;  %v1407_v48 = vsel %vm193_vm5, %v1406_v63, %v1405_v35  ;;  %v1410_v7 = vrot.slane %v2464_v3, 3 }
 0x6c1   :  { %v2468_v9 = vpop.eup %2467  ;;  %v1409_v52 = vsel %vm196_vm6, %v1408_v42, %v1407_v48  ;;  %v1412_v43 = vrot.slane %v2466_v4, 2  ;;  %v1596_v48 = vpop.permute.xlu1 %1595 }
 0x6c2   :  { %v2470_v10 = vpop.eup %2469  ;;  %v1411_v13 = vsel %vm199_vm7, %v1410_v7, %v1409_v52  ;;  %v1414_v11 = vrot.slane %v2468_v9, 1  ;;  %vm1597_vm14 = vcmp.eq.s32.totalorder %v1596_v48, 1 }
 0x6c3   :  { %v1413_v56 = vsel %vm202_vm8, %v1412_v43, %v1411_v13  ;;  %v2472_v2 = vpop.eup %2471  ;;  %v1417_v16 = vrot.slane %v2470_v10, 7 }
 0x6c4   :  { %v1415_v15 = vsel %vm205_vm9, %v1414_v11, %v1413_v56 }
 0x6c5   :  { %v1416_v19 = vsel %vm208_vm10, %v2472_v2, %v1415_v15 }
 0x6c6   :  { %v1418_v20 = vsel %vm211_vm11, %v1417_v16, %v1416_v19 }
 0x6c7   :  { %v1420_v23 = vsel %vm1396_vm13, %v1418_v20, %v2973_v22  ;;  %v1421_v24 = vsel %vm1396_vm13, %v1418_v20, 0.0 }
 0x6c8   :  { %v1423_v26 = vcombine.high %v1421_v24, %v1421_v24  ;;  %v1430_v5 = vrot.slane %v1421_v24, %v2745_v27  ;;  %2155 = vmatmul.mubr.f32.vlgmr.msra.gmra.mrb[6].mxu1 %v1420_v23 }
 0x6ca   :  { %v1437_v29 = vrot.slane %v1423_v26, %v2745_v27  ;;  %v1438_v30 = vcombine.high %v1430_v5, %v1430_v5  ;;  %v1446_v34 = vrot.slane %v1430_v5, %v2745_v27  ;;  %1732 = vst.sshfl [vmem:[#allocation8 + $0x6] sm:$0x1 pattern:$0x73625140] %v1430_v5 }
 0x6cc   :  { %v1439_v39 = vcombine.high %v1437_v29, %v1437_v29  ;;  %v1453_v40 = vrot.slane %v1437_v29, %v2745_v27  ;;  %v1460_v41 = vrot.slane %v1438_v30, %v2745_v27  ;;  %v1468_v37 = vcombine.high %v1446_v34, %v1446_v34  ;;  %1733 = vst.sshfl [vmem:[#allocation8 + $0xe] sm:$0x1 pattern:$0x73625140] %v1438_v30 }
 0x6cd   :  { %1734 = vst.sshfl [vmem:[#allocation8 + $0x26] sm:$0x1 pattern:$0x73625140] %v1437_v29 }
 0x6ce   :  { %v1467_v22 = vrot.slane %v1439_v39, %v2745_v27  ;;  %v1469_v44 = vcombine.high %v1453_v40, %v1453_v40  ;;  %v1470_v45 = vcombine.high %v1460_v41, %v1460_v41  ;;  %1482 = vst [vmem:[#allocation8 + $0x16] sm:$0x1] %v1468_v37  ;;  %1735 = vst.sshfl [vmem:[#allocation8 + $0x2e] sm:$0x1 pattern:$0x73625140] %v1439_v39 }
 0x6d0   :  { %v1471_v46 = vcombine.high %v1467_v22, %v1467_v22  ;;  %1483 = vst [vmem:[#allocation8 + $0x1e] sm:$0x1] %v1470_v45  ;;  %1486 = vst [vmem:[#allocation8 + $0x36] sm:$0x1] %v1469_v44 }
 0x6d2   :  { %1487 = vst [vmem:[#allocation8 + $0x3e] sm:$0x1] %v1471_v46 }
 0x79b   :  { %v1554_v18 = vpop.f32.mrb[6].mxu1 }
 0x79c   :  { %v1559_v47 = vrot.slane %v1554_v18, 1  ;;  %v1560_v49 = vrot.slane %v1554_v18, 2  ;;  %v1561_v50 = vrot.slane %v1554_v18, 3  ;;  %v1562_v1 = vrot.slane %v1554_v18, 4  ;;  %v2156_v6 = vpop.f32.mrb[7].mxu1 }
 0x79d   :  { %v1563_v51 = vrot.slane %v1554_v18, 5  ;;  %v1564_v53 = vrot.slane %v1554_v18, 6  ;;  %v1565_v12 = vrot.slane %v1554_v18, 7  ;;  %v1581_v38 = vadd.f32 %v3000_v0, %v1554_v18 }
 0x79e   :  { %v1574_v17 = vadd.f32 %v2982_v8, %v1559_v47  ;;  %v1575_v57 = vadd.f32 %v2985_v54, %v1560_v49  ;;  %v1576_v58 = vadd.f32 %v2988_v55, %v1561_v50  ;;  %v1577_v59 = vadd.f32 %v2991_v21, %v1562_v1 }
 0x79f   :  { %v1578_v60 = vadd.f32 %v2994_v25, %v1563_v51  ;;  %v1579_v28 = vadd.f32 %v2997_v61, %v1564_v53  ;;  %v1580_v31 = vadd.f32 %v3003_v62, %v1565_v12 }
 0x7a0   :  { %2473 = vtanh.f32 %v1574_v17 }
 0x7a1   :  { %2475 = vtanh.f32 %v1575_v57 }
 0x7a2   :  { %2477 = vtanh.f32 %v1576_v58 }
 0x7a3   :  { %2479 = vtanh.f32 %v1577_v59 }
 0x7a4   :  { %2481 = vtanh.f32 %v1578_v60 }
 0x7a5   :  { %2483 = vtanh.f32 %v1579_v28 }
 0x7a6   :  { %2485 = vtanh.f32 %v1580_v31 }
 0x7a7   :  { %2487 = vtanh.f32 %v1581_v38 }
 0x7aa   :  { %v2474_v8 = vpop.eup %2473 }
 0x7ab   :  { %v2476_v54 = vpop.eup %2475  ;;  %v1606_v55 = vrot.slane %v2474_v8, 7 }
 0x7ac   :  { %v2478_v21 = vpop.eup %2477  ;;  %v1607_v32 = vrot.slane %v2476_v54, 6 }
 0x7ad   :  { %v2480_v25 = vpop.eup %2479  ;;  %v1609_v33 = vrot.slane %v2478_v21, 5 }
 0x7ae   :  { %v2482_v35 = vpop.eup %2481  ;;  %v1608_v61 = vsel %vm193_vm5, %v1607_v32, %v1606_v55  ;;  %v1611_v36 = vrot.slane %v2480_v25, 4 }
 0x7af   :  { %v2484_v62 = vpop.eup %2483  ;;  %v1610_v63 = vsel %vm196_vm6, %v1609_v33, %v1608_v61  ;;  %v1613_v3 = vrot.slane %v2482_v35, 3 }
 0x7b0   :  { %v2486_v42 = vpop.eup %2485  ;;  %v1612_v0 = vsel %vm199_vm7, %v1611_v36, %v1610_v63  ;;  %v1615_v4 = vrot.slane %v2484_v62, 2 }
 0x7b1   :  { %v1614_v7 = vsel %vm202_vm8, %v1613_v3, %v1612_v0  ;;  %v1617_v9 = vrot.slane %v2486_v42, 1  ;;  %v2488_v43 = vpop.eup %2487 }
 0x7b2   :  { %v1616_v52 = vsel %vm205_vm9, %v1615_v4, %v1614_v7 }
 0x7b3   :  { %v1618_v10 = vsel %vm208_vm10, %v1617_v9, %v1616_v52 }
 0x7b4   :  { %v1619_v13 = vsel %vm211_vm11, %v2488_v43, %v1618_v10 }
 0x7b5   :  { %v1622_v11 = vsel %vm1597_vm14, %v1619_v13, 0.0 }
 0x7b6   :  { %v1624_v14 = vcombine.high %v1622_v11, %v1622_v11  ;;  %v1631_v56 = vrot.slane %v1622_v11, %v2745_v27 }
 0x7b8   :  { %v1638_v2 = vrot.slane %v1624_v14, %v2745_v27  ;;  %v1639_v15 = vcombine.high %v1631_v56, %v1631_v56  ;;  %v1647_v16 = vrot.slane %v1631_v56, %v2745_v27  ;;  %1736 = vst.sshfl [vmem:[#allocation8 + $0x7] sm:$0x1 pattern:$0x73625140] %v1631_v56 }
 0x7ba   :  { %v1640_v19 = vcombine.high %v1638_v2, %v1638_v2  ;;  %v1654_v20 = vrot.slane %v1638_v2, %v2745_v27  ;;  %v1661_v23 = vrot.slane %v1639_v15, %v2745_v27  ;;  %v1669_v24 = vcombine.high %v1647_v16, %v1647_v16  ;;  %1737 = vst.sshfl [vmem:[#allocation8 + $0xf] sm:$0x1 pattern:$0x73625140] %v1639_v15 }
 0x7bb   :  { %1738 = vst.sshfl [vmem:[#allocation8 + $0x27] sm:$0x1 pattern:$0x73625140] %v1638_v2 }
 0x7bc   :  { %v1668_v26 = vrot.slane %v1640_v19, %v2745_v27  ;;  %v1670_v5 = vcombine.high %v1654_v20, %v1654_v20  ;;  %v1671_v29 = vcombine.high %v1661_v23, %v1661_v23  ;;  %1683 = vst [vmem:[#allocation8 + $0x17] sm:$0x1] %v1669_v24  ;;  %1739 = vst.sshfl [vmem:[#allocation8 + $0x2f] sm:$0x1 pattern:$0x73625140] %v1640_v19 }
 0x7be   :  { %v1672_v30 = vcombine.high %v1668_v26, %v1668_v26  ;;  %1684 = vst [vmem:[#allocation8 + $0x1f] sm:$0x1] %v1671_v29  ;;  %1687 = vst [vmem:[#allocation8 + $0x37] sm:$0x1] %v1670_v5 }
 0x7c0   :  { %1688 = vst [vmem:[#allocation8 + $0x3f] sm:$0x1] %v1672_v30 }
 0x7c1   :  { %2552 = shalt.err (!%p2549_p6)
}
 0x7c2   :  { %s2553_s15 = scalar_lea.hbm %s3059_s3, 1024 }
 0x7c3   :  { %p2554_p7 = scmp.ne.s32.totalorder %s3059_s3, %s2553_s15  ;;  %p2557_p8 = scmp.lt.u32.totalorder %s2553_s15, %s3059_s3 }
 0x7c5   :  { %p2559_p9 = pnand %p2557_p8, %p2554_p7 }
 0x7c7   :  { %2562 = shalt.err (!%p2559_p9)
}
 0x7c8   :  { %1701 = dma.vmem_to_hbm [thread:$0]  %s1696_s11, 1024, %s3059_s3, [#allocation5], %s2570_s22, %s2570_s22, %s2571_s23  }
 0x7c9   :  { %2567 = dma.done.wait [#allocation5], 1024  }
 0x7ca   :  { %2568 = vsyncadd [#allocation5], 4294966272 }
 0x7cb   :  { %1705 = vsyncpa [#allocation4], 1 }
 0x7cc   :  { %1706 = vsyncpa [#allocation7], 1 }
 0x7cd   :  { %1707 = vsyncpa [#allocation5], 1 }

</bundles_post_ra>
